<compile_context>
chip_gen: v7x
topology: tpu7x:2x2x1
jax: 0.10.0
libtpu: 0.0.40
codegen_flags: <defaults>
</compile_context>

<pallas_src>
import functools

import jax
import jax.numpy as jnp
from jax.experimental import pallas as pl
from jax.experimental.pallas import tpu as pltpu

BN_EPS = 1e-5
C_ENC = 1280        # encoder output channels (EfficientNet-B1 = 1280)
K_PAD = 32          # im2col K (3*3*3 = 27) padded to 32 for clean MXU tiles
TS_CAP = 512        # max spatial rows per conv tile (fits all VMEM budgets)

_VMEM_SPEC = pl.BlockSpec(memory_space=pltpu.MemorySpace.VMEM)


def _round_up(x, m):
    return ((x + m - 1) // m) * m


# ---------------------------------------------------------------------------
# Kernel 1: fused encoder conv (as im2col matmul) + global max/avg pooling.
# grid = (B, n_spatial_tiles).  Outputs (B, 1, C) max and avg pooled vectors;
# the full (B, Ho, Wo, C) feature map never touches HBM.
# ---------------------------------------------------------------------------
def _conv_pool_kernel(p_ref, w_ref, b_ref, max_ref, avg_ref, *, hwo, ts):
    t = pl.program_id(1)

    @pl.when(t == 0)
    def _():
        # ReLU output is >= 0, so 0 is a valid identity for the running max.
        max_ref[...] = jnp.zeros_like(max_ref)
        avg_ref[...] = jnp.zeros_like(avg_ref)

    x = p_ref[0]                                              # (ts, K_PAD) bf16
    acc = jnp.dot(x, w_ref[...], preferred_element_type=jnp.float32)
    acc = jnp.maximum(acc + b_ref[...], 0.0)                  # f32 VPU epilogue

    # Mask spatial padding rows (they contribute 0 to both max and sum).
    row = jax.lax.broadcasted_iota(jnp.int32, (ts, 1), 0) + t * ts
    acc = jnp.where(row < hwo, acc, 0.0)

    max_ref[0] = jnp.maximum(max_ref[0], jnp.max(acc, axis=0, keepdims=True))
    avg_ref[0] = avg_ref[0] + jnp.sum(acc, axis=0, keepdims=True)

    @pl.when(t == pl.num_programs(1) - 1)
    def _():
        avg_ref[...] = avg_ref[...] * (1.0 / hwo)


def conv_pool(patches, w_conv, b_conv, *, hwo, ts):
    B, hwo_pad, kpad = patches.shape
    C = w_conv.shape[1]
    n_tiles = hwo_pad // ts

    flops = 2 * B * hwo_pad * kpad * C
    bytes_accessed = (patches.size * 2 + w_conv.size * 2
                      + b_conv.size * 4 + 2 * B * C * 4)

    max_o, avg_o = pl.pallas_call(
        functools.partial(_conv_pool_kernel, hwo=hwo, ts=ts),
        out_shape=(jax.ShapeDtypeStruct((B, 1, C), jnp.float32),
                   jax.ShapeDtypeStruct((B, 1, C), jnp.float32)),
        grid_spec=pltpu.PrefetchScalarGridSpec(
            num_scalar_prefetch=0,
            grid=(B, n_tiles),
            in_specs=[
                pl.BlockSpec((1, ts, kpad), lambda b, t: (b, t, 0)),
                pl.BlockSpec((kpad, C), lambda b, t: (0, 0)),
                pl.BlockSpec((1, C), lambda b, t: (0, 0)),
            ],
            out_specs=(
                pl.BlockSpec((1, 1, C), lambda b, t: (b, 0, 0)),
                pl.BlockSpec((1, 1, C), lambda b, t: (b, 0, 0)),
            ),
        ),
        compiler_params=pltpu.CompilerParams(
            dimension_semantics=("parallel", "arbitrary"),
            vmem_limit_bytes=32 * 1024 * 1024,
        ),
        cost_estimate=pl.CostEstimate(
            flops=flops, transcendentals=0, bytes_accessed=bytes_accessed),
    )(patches, w_conv, b_conv)
    return max_o.reshape(B, C), avg_o.reshape(B, C)


# ---------------------------------------------------------------------------
# Kernel 2: fused head.  BatchNorm is pre-folded into dense1 (host side);
# dense1 is two K=1280 matmuls (no concat); the three first head layers are
# one (512,192) matmul; the three second layers are one block-diagonal
# (192,11) matmul; prediction logic + final 3->1 head; outputs packed into a
# lane-dense (B,128) buffer.
# ---------------------------------------------------------------------------
def _head_kernel(xmax_ref, xavg_ref,
                 wtop_ref, wbot_ref, bd_ref,
                 w1_ref, b1_ref, w2_ref, b2_ref,
                 wf_ref, bf_ref,
                 enc_ref, packed_ref):
    # dense1 (+folded BN) + ReLU  -> enc_out
    h = (jnp.dot(xmax_ref[...], wtop_ref[...], preferred_element_type=jnp.float32)
         + jnp.dot(xavg_ref[...], wbot_ref[...], preferred_element_type=jnp.float32)
         + bd_ref[...])
    h = jnp.maximum(h, 0.0)
    enc_ref[...] = h

    # merged first layer of the three heads + ReLU (Dropout = identity, eval)
    a = jnp.dot(h, w1_ref[...], preferred_element_type=jnp.float32) + b1_ref[...]
    a = jnp.maximum(a, 0.0)                                   # (B, 192)

    # merged block-diagonal second layer -> [class(5) | reg(1) | ord(5)]
    out_all = jnp.dot(a, w2_ref[...], preferred_element_type=jnp.float32) + b2_ref[...]

    class_out = out_all[:, 0:5]
    reg_out = out_all[:, 5:6]
    ord_out = out_all[:, 6:11]

    # y_pred_class = argmax(softmax(class_out)) == argmax(class_out)
    cmax = jnp.max(class_out, axis=1, keepdims=True)
    col = jax.lax.broadcasted_iota(jnp.float32, class_out.shape, 1)
    y_class = jnp.min(
        jnp.where(class_out >= cmax, col, jnp.float32(class_out.shape[1])),
        axis=1, keepdims=True)                                # (B, 1)

    # y_pred_reg = bucketize(reg_out, [0.5,1.5,2.5,3.5], right=False)
    r = reg_out
    y_reg = ((r > 0.5).astype(jnp.float32) + (r > 1.5).astype(jnp.float32)
             + (r > 2.5).astype(jnp.float32) + (r > 3.5).astype(jnp.float32))

    # y_pred_ord = sum(round(sigmoid(ord_out)), dim=1) - 1
    y_ord = jnp.sum(jnp.round(jax.nn.sigmoid(ord_out)), axis=1, keepdims=True) - 1.0

    feats = jnp.concatenate([y_class, y_reg, y_ord], axis=1)  # (B, 3)
    final = jnp.sum(feats * wf_ref[...], axis=1, keepdims=True) + bf_ref[...]

    # Pack [class(5) | reg(1) | ord(5) | final(1) | zeros] into 128 lanes.
    B = out_all.shape[0]
    packed = jnp.concatenate(
        [out_all, final, jnp.zeros((B, 128 - 12), jnp.float32)], axis=1)
    packed_ref[...] = packed


def head_forward(max_pooled, avg_pooled, kp):
    B = max_pooled.shape[0]
    return pl.pallas_call(
        _head_kernel,
        out_shape=(jax.ShapeDtypeStruct((B, 512), jnp.float32),   # enc_out
                   jax.ShapeDtypeStruct((B, 128), jnp.float32)),  # packed small outs
        in_specs=[_VMEM_SPEC] * 11,
        out_specs=(_VMEM_SPEC, _VMEM_SPEC),
    )(max_pooled, avg_pooled,
      kp["w_top"], kp["w_bot"], kp["b_d1"],
      kp["w1"], kp["b1"], kp["w2"], kp["b2"],
      kp["w_f"], kp["b_f"])


# ---------------------------------------------------------------------------
# Host-side glue: im2col (3x3, stride 2, pad 1), K padded to 32, spatial rows
# padded to a tile multiple, bf16 for the MXU operands.
# ---------------------------------------------------------------------------
def im2col_padded(x_nhwc, kh, kw, stride, pad):
    B, H, W, C = x_nhwc.shape
    xp = jnp.pad(x_nhwc, ((0, 0), (pad, pad), (pad, pad), (0, 0)))
    Ho = (H + 2 * pad - kh) // stride + 1
    Wo = (W + 2 * pad - kw) // stride + 1
    patches = []
    for i in range(kh):
        for j in range(kw):
            patches.append(xp[:, i:i + Ho * stride:stride,
                              j:j + Wo * stride:stride, :])
    p = jnp.concatenate(patches, axis=-1)             # (B, Ho, Wo, kh*kw*C)
    K = kh * kw * C
    hwo = Ho * Wo
    p = p.reshape(B, hwo, K)

    ts = min(TS_CAP, _round_up(hwo, 16))              # bf16 sublane tile = 16
    hwo_pad = _round_up(hwo, ts)
    p = jnp.pad(p, ((0, 0), (0, hwo_pad - hwo), (0, K_PAD - K)))
    return p.astype(jnp.bfloat16), Ho, Wo, ts


# ---------------------------------------------------------------------------
# Parameter initialization (deterministic, synthetic) + host-side folding.
# ---------------------------------------------------------------------------
def init_params(key):
    ks = jax.random.split(key, 24)

    def dense(k, fan_in, fan_out):
        return jax.random.normal(k, (fan_in, fan_out), jnp.float32) / jnp.sqrt(fan_in)

    p = {}
    # synthetic encoder conv: 3x3x3 -> 1280
    p["w_conv"] = dense(ks[0], 27, C_ENC)
    p["b_conv"] = jax.random.normal(ks[1], (C_ENC,), jnp.float32) * 0.01
    # BatchNorm1d x2 (eval-mode running stats)
    p["bn1_g"] = 1.0 + 0.1 * jax.random.normal(ks[2], (1, C_ENC), jnp.float32)
    p["bn1_b"] = 0.1 * jax.random.normal(ks[3], (1, C_ENC), jnp.float32)
    p["bn1_m"] = 0.1 * jax.random.normal(ks[4], (1, C_ENC), jnp.float32)
    p["bn1_v"] = 1.0 + 0.1 * jnp.abs(jax.random.normal(ks[5], (1, C_ENC), jnp.float32))
    p["bn2_g"] = 1.0 + 0.1 * jax.random.normal(ks[6], (1, C_ENC), jnp.float32)
    p["bn2_b"] = 0.1 * jax.random.normal(ks[7], (1, C_ENC), jnp.float32)
    p["bn2_m"] = 0.1 * jax.random.normal(ks[8], (1, C_ENC), jnp.float32)
    p["bn2_v"] = 1.0 + 0.1 * jnp.abs(jax.random.normal(ks[9], (1, C_ENC), jnp.float32))
    # dense1: Linear(2560, 512)
    p["w_d1"] = dense(ks[10], 2 * C_ENC, 512)
    p["b_d1"] = 0.01 * jax.random.normal(ks[11], (1, 512), jnp.float32)
    # classification head: 512 -> 64 -> 5
    p["w_c1"] = dense(ks[12], 512, 64)
    p["b_c1"] = 0.01 * jax.random.normal(ks[13], (1, 64), jnp.float32)
    p["w_c2"] = dense(ks[14], 64, 5)
    p["b_c2"] = 0.01 * jax.random.normal(ks[15], (1, 5), jnp.float32)
    # regression head: 512 -> 64 -> 1
    p["w_r1"] = dense(ks[16], 512, 64)
    p["b_r1"] = 0.01 * jax.random.normal(ks[17], (1, 64), jnp.float32)
    p["w_r2"] = dense(ks[18], 64, 1)
    p["b_r2"] = 0.01 * jax.random.normal(ks[19], (1, 1), jnp.float32)
    # ordinal head: 512 -> 64 -> 5
    p["w_o1"] = dense(ks[20], 512, 64)
    p["b_o1"] = 0.01 * jax.random.normal(ks[21], (1, 64), jnp.float32)
    p["w_o2"] = dense(ks[22], 64, 5)
    p["b_o2"] = 0.01 * jax.random.normal(ks[23], (1, 5), jnp.float32)
    # final head: Linear(3, 1), stored as (1, 3) row for lane-broadcast
    p["w_f"] = jnp.array([[0.4, 0.35, 0.25]], jnp.float32)
    p["b_f"] = jnp.array([[0.05]], jnp.float32)
    return p


def prepare_kernel_params(p):
    """Constant-fold eval-mode BatchNorm into dense1, merge the head layers."""
    scale1 = p["bn1_g"] * jax.lax.rsqrt(p["bn1_v"] + BN_EPS)   # (1, 1280)
    shift1 = p["bn1_b"] - p["bn1_m"] * scale1
    scale2 = p["bn2_g"] * jax.lax.rsqrt(p["bn2_v"] + BN_EPS)
    shift2 = p["bn2_b"] - p["bn2_m"] * scale2

    w_top_raw = p["w_d1"][:C_ENC]          # rows for max-pooled half of concat
    w_bot_raw = p["w_d1"][C_ENC:]          # rows for avg-pooled half
    w_top = w_top_raw * scale1.T                                # (1280, 512)
    w_bot = w_bot_raw * scale2.T
    b_d1 = p["b_d1"] + shift1 @ w_top_raw + shift2 @ w_bot_raw  # (1, 512)

    # merged first layers: (512, 192), biases (1, 192)
    w1 = jnp.concatenate([p["w_c1"], p["w_r1"], p["w_o1"]], axis=1)
    b1 = jnp.concatenate([p["b_c1"], p["b_r1"], p["b_o1"]], axis=1)

    # block-diagonal merged second layers: (192, 11) -> [class(5)|reg(1)|ord(5)]
    w2 = jnp.zeros((192, 11), jnp.float32)
    w2 = w2.at[0:64, 0:5].set(p["w_c2"])
    w2 = w2.at[64:128, 5:6].set(p["w_r2"])
    w2 = w2.at[128:192, 6:11].set(p["w_o2"])
    b2 = jnp.concatenate([p["b_c2"], p["b_r2"], p["b_o2"]], axis=1)

    # conv weights: pad K 27 -> 32 with zero rows, bf16 MXU operands
    w_conv = jnp.pad(p["w_conv"], ((0, K_PAD - p["w_conv"].shape[0]), (0, 0)))

    return {
        "w_conv": w_conv.astype(jnp.bfloat16),
        "b_conv": p["b_conv"].reshape(1, C_ENC).astype(jnp.float32),
        "w_top": w_top, "w_bot": w_bot, "b_d1": b_d1,
        "w1": w1, "b1": b1, "w2": w2, "b2": b2,
        "w_f": p["w_f"], "b_f": p["b_f"],
    }


# ---------------------------------------------------------------------------
# Full forward pass.
# ---------------------------------------------------------------------------
def three_head_cnn_forward(x_nchw, kparams):
    # NCHW -> NHWC for the conv/pool path.
    x = jnp.transpose(x_nchw, (0, 2, 3, 1)).astype(jnp.float32)

    # im2col for the synthetic encoder conv (3x3, stride 2, pad 1).
    patches, Ho, Wo, ts = im2col_padded(x, 3, 3, stride=2, pad=1)

    # Fused conv + ReLU + global max/avg pooling (single gridded kernel).
    max_pooled, avg_pooled = conv_pool(
        patches, kparams["w_conv"], kparams["b_conv"], hwo=Ho * Wo, ts=ts)

    # Fused head kernel; small outputs come back packed in 128 lanes.
    # TODO(synk): at batch=2 every head matmul wastes most of the MXU M dim;
    # batch multiple requests to B>=8 to recover it.
    enc_out, packed = head_forward(max_pooled, avg_pooled, kparams)

    class_out = packed[:, 0:5]
    reg_out = packed[:, 5]
    ord_out = packed[:, 6:11]
    final_out = packed[:, 11]
    return class_out, reg_out, ord_out, enc_out, final_out


if __name__ == "__main__":
    key = jax.random.PRNGKey(0)
    x = jax.random.normal(key, (2, 3, 16, 16), dtype=jnp.float32)  # NCHW
    params = init_params(jax.random.PRNGKey(42))
    kparams = prepare_kernel_params(params)

    outs = three_head_cnn_forward(x, kparams)
    outs = jax.block_until_ready(outs)

    class_out, reg_out, ord_out, enc_out, final_out = outs
    assert class_out.shape == (2, 5)
    assert reg_out.shape == (2,)
    assert ord_out.shape == (2, 5)
    assert enc_out.shape == (2, 512)
    assert final_out.shape == (2,)
    assert all(bool(jnp.all(jnp.isfinite(o))) for o in outs)
    print("KERNEL_OK")
</pallas_src>

<mosaic_0001>
module attributes {stable_mosaic.version = 11 : i64} {
  func.func @_conv_pool_kernel(%arg0: i32, %arg1: i32, %arg2: memref<1x64x32xbf16, #tpu.memory_space<vmem>>, %arg3: memref<32x1280xbf16, #tpu.memory_space<vmem>>, %arg4: memref<1x1280xf32, #tpu.memory_space<vmem>>, %arg5: memref<1x1x1280xf32, #tpu.memory_space<vmem>>, %arg6: memref<1x1x1280xf32, #tpu.memory_space<vmem>>) attributes {dimension_semantics = [#tpu.dimension_semantics<parallel>, #tpu.dimension_semantics<arbitrary>], iteration_bounds = array<i64: 2, 1>, scalar_prefetch = 0 : i64, scratch_operands = 0 : i64, tpu.core_type = #tpu.core_type<tc>, window_params = [{transform_indices = @transform_0, window_bounds = array<i64: 1, 64, 32>}, {pipeline_mode = #tpu.pipeline_mode<synchronous>, transform_indices = @transform_1, window_bounds = array<i64: 32, 1280>}, {pipeline_mode = #tpu.pipeline_mode<synchronous>, transform_indices = @transform_2, window_bounds = array<i64: 1, 1280>}, {transform_indices = @transform_3, window_bounds = array<i64: 1, 1, 1280>}, {transform_indices = @transform_4, window_bounds = array<i64: 1, 1, 1280>}]} {
    %c0_i32 = arith.constant 0 : i32
    %0 = arith.cmpi eq, %arg1, %c0_i32 : i32
    %1 = arith.extui %0 : i1 to i32
    %c0_i32_0 = arith.constant 0 : i32
    %2 = arith.cmpi ne, %1, %c0_i32_0 : i32
    scf.if %2 {
      %cst_26 = arith.constant 0.000000e+00 : f32
      %41 = vector.broadcast %cst_26 : f32 to vector<1x1x1280xf32>
      %c0_27 = arith.constant 0 : index
      %c0_28 = arith.constant 0 : index
      %c0_29 = arith.constant 0 : index
      %42 = vector.load %arg5[%c0_27, %c0_28, %c0_29] : memref<1x1x1280xf32, #tpu.memory_space<vmem>>, vector<1x1x1280xf32>
      tpu.vector_store %arg5[%c0_27, %c0_28, %c0_29], %41 {strides = array<i32>} : memref<1x1x1280xf32, #tpu.memory_space<vmem>>, vector<1x1x1280xf32>,
      %cst_30 = arith.constant 0.000000e+00 : f32
      %43 = vector.broadcast %cst_30 : f32 to vector<1x1x1280xf32>
      %c0_31 = arith.constant 0 : index
      %c0_32 = arith.constant 0 : index
      %c0_33 = arith.constant 0 : index
      %44 = vector.load %arg6[%c0_31, %c0_32, %c0_33] : memref<1x1x1280xf32, #tpu.memory_space<vmem>>, vector<1x1x1280xf32>
      tpu.vector_store %arg6[%c0_31, %c0_32, %c0_33], %43 {strides = array<i32>} : memref<1x1x1280xf32, #tpu.memory_space<vmem>>, vector<1x1x1280xf32>,
    } else {
    }
    %c0 = arith.constant 0 : index
    %c0_1 = arith.constant 0 : index
    %c0_2 = arith.constant 0 : index
    %3 = vector.load %arg2[%c0, %c0_1, %c0_2] : memref<1x64x32xbf16, #tpu.memory_space<vmem>>, vector<1x64x32xbf16>
    %4 = vector.shape_cast %3 : vector<1x64x32xbf16> to vector<64x32xbf16>
    %c0_3 = arith.constant 0 : index
    %c0_4 = arith.constant 0 : index
    %5 = vector.load %arg3[%c0_3, %c0_4] : memref<32x1280xbf16, #tpu.memory_space<vmem>>, vector<32x1280xbf16>
    %cst = arith.constant dense<0.000000e+00> : vector<64x1280xf32>
    %6 = tpu.matmul %4, %5, %cst {dimension_numbers = #tpu.dot_dimension_numbers<[1], [0], [0], [1], [0, 0, 1, 1], [], []>} : vector<64x32xbf16>, vector<32x1280xbf16>, vector<64x1280xf32> -> vector<64x1280xf32>
    %c0_5 = arith.constant 0 : index
    %c0_6 = arith.constant 0 : index
    %7 = vector.load %arg4[%c0_5, %c0_6] : memref<1x1280xf32, #tpu.memory_space<vmem>>, vector<1x1280xf32>
    %8 = vector.broadcast %7 : vector<1x1280xf32> to vector<64x1280xf32>
    %9 = arith.addf %6, %8 : vector<64x1280xf32>
    %cst_7 = arith.constant 0.000000e+00 : f32
    %10 = vector.broadcast %cst_7 : f32 to vector<64x1280xf32>
    %11 = arith.maximumf %9, %10 : vector<64x1280xf32>
    %12 = tpu.iota {dimensions = array<i32: 0>} : vector<64x1xi32>
    %c64_i32 = arith.constant 64 : i32
    %13 = arith.muli %arg1, %c64_i32 : i32
    %14 = vector.broadcast %13 : i32 to vector<64x1xi32>
    %15 = arith.addi %12, %14 : vector<64x1xi32>
    %c64_i32_8 = arith.constant 64 : i32
    %16 = vector.broadcast %c64_i32_8 : i32 to vector<64x1xi32>
    %17 = arith.cmpi slt, %15, %16 : vector<64x1xi32>
    %cst_9 = arith.constant 0.000000e+00 : f32
    %18 = vector.shape_cast %17 : vector<64x1xi1> to vector<64x1xi1>
    %19 = vector.broadcast %18 : vector<64x1xi1> to vector<64x1280xi1>
    %20 = vector.broadcast %cst_9 : f32 to vector<64x1280xf32>
    %21 = arith.select %19, %11, %20 : vector<64x1280xi1>, vector<64x1280xf32>
    %c0_10 = arith.constant 0 : index
    %c0_11 = arith.constant 0 : index
    %c0_12 = arith.constant 0 : index
    %22 = vector.load %arg5[%c0_10, %c0_11, %c0_12] : memref<1x1x1280xf32, #tpu.memory_space<vmem>>, vector<1x1x1280xf32>
    %23 = vector.shape_cast %22 : vector<1x1x1280xf32> to vector<1x1280xf32>
    %cst_13 = arith.constant dense<0xFF800000> : vector<1280xf32>
    %24 = vector.multi_reduction <maximumf>, %21, %cst_13 [0] : vector<64x1280xf32> to vector<1280xf32>
    %25 = vector.shape_cast %24 : vector<1280xf32> to vector<1x1280xf32>
    %26 = arith.maximumf %23, %25 : vector<1x1280xf32>
    %c0_14 = arith.constant 0 : index
    %c0_15 = arith.constant 0 : index
    %c0_16 = arith.constant 0 : index
    %27 = vector.load %arg5[%c0_14, %c0_15, %c0_16] : memref<1x1x1280xf32, #tpu.memory_space<vmem>>, vector<1x1x1280xf32>
    %28 = vector.shape_cast %27 : vector<1x1x1280xf32> to vector<1x1280xf32>
    %29 = vector.shape_cast %26 : vector<1x1280xf32> to vector<1x1x1280xf32>
    tpu.vector_store %arg5[%c0_14, %c0_15, %c0_16], %29 {strides = array<i32>} : memref<1x1x1280xf32, #tpu.memory_space<vmem>>, vector<1x1x1280xf32>,
    %c0_17 = arith.constant 0 : index
    %c0_18 = arith.constant 0 : index
    %c0_19 = arith.constant 0 : index
    %30 = vector.load %arg6[%c0_17, %c0_18, %c0_19] : memref<1x1x1280xf32, #tpu.memory_space<vmem>>, vector<1x1x1280xf32>
    %31 = vector.shape_cast %30 : vector<1x1x1280xf32> to vector<1x1280xf32>
    %cst_20 = arith.constant dense<0.000000e+00> : vector<1280xf32>
    %32 = vector.multi_reduction <add>, %21, %cst_20 [0] : vector<64x1280xf32> to vector<1280xf32>
    %33 = vector.shape_cast %32 : vector<1280xf32> to vector<1x1280xf32>
    %34 = arith.addf %31, %33 : vector<1x1280xf32>
    %c0_21 = arith.constant 0 : index
    %c0_22 = arith.constant 0 : index
    %c0_23 = arith.constant 0 : index
    %35 = vector.load %arg6[%c0_21, %c0_22, %c0_23] : memref<1x1x1280xf32, #tpu.memory_space<vmem>>, vector<1x1x1280xf32>
    %36 = vector.shape_cast %35 : vector<1x1x1280xf32> to vector<1x1280xf32>
    %37 = vector.shape_cast %34 : vector<1x1280xf32> to vector<1x1x1280xf32>
    tpu.vector_store %arg6[%c0_21, %c0_22, %c0_23], %37 {strides = array<i32>} : memref<1x1x1280xf32, #tpu.memory_space<vmem>>, vector<1x1x1280xf32>,
    %c0_i32_24 = arith.constant 0 : i32
    %38 = arith.cmpi eq, %arg1, %c0_i32_24 : i32
    %39 = arith.extui %38 : i1 to i32
    %c0_i32_25 = arith.constant 0 : i32
    %40 = arith.cmpi ne, %39, %c0_i32_25 : i32
    scf.if %40 {
      %c0_26 = arith.constant 0 : index
      %c0_27 = arith.constant 0 : index
      %c0_28 = arith.constant 0 : index
      %41 = vector.load %arg6[%c0_26, %c0_27, %c0_28] : memref<1x1x1280xf32, #tpu.memory_space<vmem>>, vector<1x1x1280xf32>
      %cst_29 = arith.constant 1.562500e-02 : f32
      %42 = vector.broadcast %cst_29 : f32 to vector<1x1x1280xf32>
      %43 = arith.mulf %41, %42 : vector<1x1x1280xf32>
      %c0_30 = arith.constant 0 : index
      %c0_31 = arith.constant 0 : index
      %c0_32 = arith.constant 0 : index
      %44 = vector.load %arg6[%c0_30, %c0_31, %c0_32] : memref<1x1x1280xf32, #tpu.memory_space<vmem>>, vector<1x1x1280xf32>
      tpu.vector_store %arg6[%c0_30, %c0_31, %c0_32], %43 {strides = array<i32>} : memref<1x1x1280xf32, #tpu.memory_space<vmem>>, vector<1x1x1280xf32>,
    } else {
    }
    return
  }
  func.func @transform_0(%arg0: i32, %arg1: i32) -> (i32, i32, i32) {
    %c0_i32 = arith.constant 0 : i32
    %c0_i32_0 = arith.constant 0 : i32
    return %arg0, %arg1, %c0_i32 : i32, i32, i32
  }
  func.func @transform_1(%arg0: i32, %arg1: i32) -> (i32, i32) {
    %c0_i32 = arith.constant 0 : i32
    %c0_i32_0 = arith.constant 0 : i32
    %c0_i32_1 = arith.constant 0 : i32
    return %c0_i32, %c0_i32_0 : i32, i32
  }
  func.func @transform_2(%arg0: i32, %arg1: i32) -> (i32, i32) {
    %c0_i32 = arith.constant 0 : i32
    %c0_i32_0 = arith.constant 0 : i32
    %c0_i32_1 = arith.constant 0 : i32
    return %c0_i32, %c0_i32_0 : i32, i32
  }
  func.func @transform_3(%arg0: i32, %arg1: i32) -> (i32, i32, i32) {
    %c0_i32 = arith.constant 0 : i32
    %c0_i32_0 = arith.constant 0 : i32
    %c0_i32_1 = arith.constant 0 : i32
    return %arg0, %c0_i32, %c0_i32_0 : i32, i32, i32
  }
  func.func @transform_4(%arg0: i32, %arg1: i32) -> (i32, i32, i32) {
    %c0_i32 = arith.constant 0 : i32
    %c0_i32_0 = arith.constant 0 : i32
    %c0_i32_1 = arith.constant 0 : i32
    return %arg0, %c0_i32, %c0_i32_0 : i32, i32, i32
  }
}

</mosaic_0001>

<bundles_post_ra>
// kernel: tpu_custom_call.1
= control target key start
LH: loop header
LB: loop body
LE: loop exit
PB: predicated region body
PF: predicated region fallthrough
CT: control target
= control target key end

     0   :  { %10 = vsyncpa [#allocation3], 0  ;;  %s2531_s0 = inlined_call_operand.vmem [shape: bf16[2,64,32], index: 0, kind: input, shape index: {}]   ;;  %s2532_s1 = inlined_call_operand.hbm [shape: bf16[32,1280], index: 1, kind: input, shape index: {}]   ;;  %s2533_s2 = inlined_call_operand.vmem [shape: f32[1,1280], index: 2, kind: input, shape index: {}]   ;;  %s2534_s3 = inlined_call_operand.hbm [shape: f32[2,1,1280], index: 3, kind: output, shape index: {0}]   ;;  %s2535_s4 = inlined_call_operand.hbm [shape: f32[2,1,1280], index: 4, kind: output, shape index: {1}]  }
   0x1   :  { %11 = vsyncpa [#allocation4], 0 }
   0x2   :  { %13 = vsyncpa [#allocation4 + $0x1], 0 }
   0x3   :  { %14 = vsyncpa [#allocation7], 0 }
   0x4   :  { %16 = vsyncpa [#allocation7 + $0x1], 0  ;;  %s1986_s15 = smov 0   ;;  %s1988_s16 = smov 0  }
   0x5   :  { %s1990_s17 = smov 0   ;;  %s1992_s18 = smov 0  }
   0x6   :  { %s1994_s19 = smov 0   ;;  %s1996_s20 = smov 0  }
   0x7 LB: > { %s1634_s21 = sadd.s32 4294967295, %s1951_s20   ;;  %s1635_s22 = sadd.s32 4294967294, %s1951_s20   ;;  %s1951_s20 = sphi %s1996_s20, %s22_s20   ;;  %s1947_s19 = sphi %s1994_s19, %s2557_s19   ;;  %s1943_s18 = sphi %s1992_s18, %s2556_s18   ;;  %s1939_s17 = sphi %s1990_s17, %s2555_s17   ;;  %s1935_s16 = sphi %s1988_s16, %s2554_s16   ;;  %s1931_s15 = sphi %s1986_s15, %s2553_s15  }
   0x8   : > { %s34_s23 = sadd.s32 1, %s1947_s19  ;;  %s111_s24 = sadd.s32 1, %s1939_s17 }
   0x9   : > { %p36_p0 = scmp.ge.s32.totalorder %s34_s23, 2  ;;  %p121_p1 = scmp.ne.s32.totalorder %s1939_s17, %s1935_s16 }
   0xa   : > { %p122_p2 = scmp.eq.s32.totalorder %s1634_s21, 1  ;;  %p127_p3 = scmp.ne.s32.totalorder %s1935_s16, %s1931_s15 }
   0xb   : > { %s2559_s23 = smov (%p36_p0, %s34_s23), 0  ;;  %p128_p5 = scmp.eq.s32.totalorder %s1635_s22, 1 }
   0xc   : > { %p2026_p4 = por %p122_p2, %p121_p1  ;;  %s108_s26 = ssub.s32 %s1947_s19, %s2559_s23 }
   0xd   : > { %p1636_p6 = scmp.ge.s32.totalorder %s1951_s20, 1  ;;  %p109_p7 = scmp.eq.s32.totalorder %s108_s26, 0 }
   0xe   : > { %s2540_s25 = scalar_select %p2026_p4, 1, 0 }
   0xf   : > { %p2033_p8 = por %p128_p5, %p127_p3  ;;  %p161_p9 = scmp.lt.s32.totalorder %s1951_s20, 3 }
  0x10   : > { %s2039_s28 = scalar_select %p109_p7, %s1939_s17, %s111_s24  }
  0x11   : > { %s2541_s27 = scalar_select %p2033_p8, 1, 0 }
  0x12   : > { %p2041_p10 = pnand %p1636_p6, %p161_p9  ;;  %p2045_p11 = scmp.eq.s32.totalorder %s1634_s21, 0 }
  0x13   : > { %s1953_s5 = smov [#allocation2]   ;;  %s1809_s10 = scalar_lea.hbm %s2532_s1, 2560 }
  0x14   : > { %s2542_s29 = scalar_select %p2041_p10, 1, 0 }
  0x15   : > { %s2543_s30 = scalar_select %p2045_p11, 1, 0 }
  0x16   : > { %p1707_p12 = pneg %p2041_p10  ;;  %s173_s6 = sshll.u32 %s1953_s5, 4  ;;  %s174_s6 = int_to_ptr.vmem [resolvable:$true] %s173_s6 }
  0x17   : > { %p1810_p0 = scmp.ne.s32.totalorder %s2532_s1, %s1809_s10  ;;  %p1816_p5 = scmp.lt.u32.totalorder %s1809_s10, %s2532_s1 }
  0x18   : > { %p2053_p13 = pnand %p2045_p11, %p1707_p12 }
  0x1a   : > { %p1811_p1 = pneg %p2053_p13 }
  0x1c   : > { %p1812_p2 = pnand %p1811_p1, %p1810_p0 }
  0x1e   : > { %p1813_p3 = pneg %p1812_p2 }
  0x20   : > { %p1818_p6 = pnand %p1816_p5, %p1813_p3 }
  0x22   : > { %1821 = shalt.err (!%p1818_p6)
}
  0x23   : > { %s1822_s21 = scalar_lea.vmem %s174_s6, 2560  ;;  %p1830_p8 = scmp.lt.s32.totalorder %s174_s6, %s174_s6 }
  0x24   : > { %p1823_p7 = scmp.ne.s32.totalorder %s174_s6, %s1822_s21  ;;  %p1831_p4 = scmp.lt.s32.totalorder %s1822_s21, %s1822_s21 }
  0x26   : > { %p1825_p9 = pnand %p1823_p7, %p1811_p1  ;;  %p1832_p11 = por %p1831_p4, %p1830_p8 }
  0x28   : > { %p1826_p12 = pneg %p1825_p9 }
  0x2a   : > { %p1833_p10 = pnand %p1832_p11, %p1826_p12 }
  0x2c   : > { %1836 = shalt.err (!%p1833_p10)
}
  0x2d   : > { %s1954_s22 = smov 640   ;;  %s1955_s24 = smov 40  }
  0x2e   : > { %1710 = dma.hbm_to_vmem [thread:$0]  (!%p2053_p13), %s2532_s1, 2560, %s174_s6, [#allocation3], %s1954_s22, %s1954_s22, %s1955_s24  }
  0x2f   : > { %p2545_p0 = scmp.ne.s32.totalorder %s2542_s29, 0 }
  0x30   : > { %p2546_p2 = scmp.ne.s32.totalorder (!%p2545_p0), %s2543_s30, 0 }
  0x31   : > { %205 = sbr.rel (%p2545_p0) target bundleno = 444 (0x1bc), region = 32 }
  0x38   : > { %1918 = dma.done.wait (%p2546_p2), [#allocation3], 2560  }
  0x39   : > { %1920 = vsyncadd (%p2546_p2), [#allocation3], 4294964736  ;;  %p241_p4 = scmp.lt.s32.totalorder %s1943_s18, 1  ;;  %v1956_v0 = vmov 0   ;;  %v1775_v1 = vld [vmem:[#allocation2 + $0x4] ss:$40 sps:$4 sm:$0xff]   ;;  %v256_v25 = vlaneseq }
  0x3a   : > { %510 = vmatprep.mubr.bf16.mxu0 %v1956_v0  ;;  %530 = vmatprep.mubr.bf16.mxu1 %v1956_v0  ;;  %v1777_v2 = vld [vmem:[#allocation2] ss:$40 sps:$4 sm:$0xff]   ;;  %v1778_v3 = vld [vmem:[#allocation2 + $0x54] ss:$40 sps:$4 sm:$0xff]   ;;  %v1780_v4 = vld [vmem:[#allocation2 + $0x50] ss:$40 sps:$4 sm:$0xff]  }
  0x3b   : > { %s242_s7 = scalar_select %p241_p4, %s1943_s18, 1  ;;  %478 = vmatprep.subr.bf16.mxu0 %v1775_v1  ;;  %1692 = vmatprep.subr.bf16.mxu1 %v1775_v1  ;;  %v1783_v7 = vld [vmem:[#allocation2 + $0x8] ss:$40 sps:$4 sm:$0xff]   ;;  %v1785_v8 = vld [vmem:[#allocation2 + $0xc] ss:$40 sps:$4 sm:$0xff]   ;;  %vm465_vm0 = vcmask 261120  }
  0x3c   : > { %479 = vmatpush1.bf16.msra.mxu0 %v1777_v2  ;;  %1694 = vmatpush1.bf16.msra.mxu1 %v1777_v2  ;;  %v1786_v9 = vld [vmem:[#allocation2 + $0x10] ss:$40 sps:$4 sm:$0xff]   ;;  %v1788_v10 = vld [vmem:[#allocation2 + $0x14] ss:$40 sps:$4 sm:$0xff]   ;;  %v1794_v13 = vld [vmem:[#allocation2 + $0x60] ss:$40 sps:$4 sm:$0xff]  }
  0x3d   : > { %s1691_s8 = sshll.u32 %s242_s7, 5  ;;  %480 = vmatprep.subr.bf16.mxu0 %v1778_v3  ;;  %1693 = vmatprep.subr.bf16.mxu1 %v1778_v3  ;;  %v1791_v11 = vld [vmem:[#allocation2 + $0x58] ss:$40 sps:$4 sm:$0xff]   ;;  %v1793_v12 = vld [vmem:[#allocation2 + $0x5c] ss:$40 sps:$4 sm:$0xff]   ;;  %s2145_s30 = sand.u32 1, %s1935_s16  }
  0x3e   : > { %s2086_s9 = scalar_lea.vmem %s2531_s0, %s1691_s8  ;;  %v1796_v14 = vld [vmem:[#allocation2 + $0x64] ss:$40 sps:$4 sm:$0xff]   ;;  %v1797_v19 = vld [vmem:[#allocation2 + $0x18] ss:$40 sps:$4 sm:$0xff]   ;;  %v1808_v22 = vld [vmem:[#allocation2 + $0x74] ss:$40 sps:$4 sm:$0xff]  }
  0x3f   : > { %v2089_v5 = vld [vmem:[%s2086_s9] sm:$0xff]   ;;  %v2092_v6 = vld [vmem:[%s2086_s9 + $0x10] sm:$0xff]   ;;  %v1789_v15 = vld [vmem:[%s2086_s9 + $0x8] sm:$0xff]   ;;  %s1696_s10 = smul.u32 10, %s2145_s30  ;;  %v2148_v26 = vshrl.u32 %v256_v25, 7  ;;  %vm2150_vm1 = vcmp.lt.s32.totalorder %v256_v25, 256 }
  0x40   : > { %481 = vmatpush1.bf16.msra.mxu0 %v1780_v4  ;;  %1695 = vmatpush1.bf16.msra.mxu1 %v1780_v4  ;;  %v1799_v16 = vld [vmem:[#allocation2 + $0x1c] ss:$40 sps:$4 sm:$0xff]   ;;  %v1800_v20 = vld [vmem:[#allocation2 + $0x20] ss:$40 sps:$4 sm:$0xff]   ;;  %v1805_v21 = vld [vmem:[#allocation2 + $0x6c] ss:$40 sps:$4 sm:$0xff]  }
  0x41   : > { %551 = vmatprep.subr.bf16.mxu1 %v1785_v8  ;;  %624 = vmatprep.subr.bf16.mxu0 %v1788_v10  ;;  %v1790_v17 = vld [vmem:[%s2086_s9 + $0x18] sm:$0xff]   ;;  %v1802_v18 = vld [vmem:[#allocation2 + $0x24] ss:$40 sps:$4 sm:$0xff]   ;;  %v1803_v23 = vld [vmem:[#allocation2 + $0x68] ss:$40 sps:$4 sm:$0xff]   ;;  %s2154_s11 = scalar_lea.vmem [#allocation5], %s1696_s10 }
  0x42   : > { %v1806_v24 = vld [vmem:[#allocation2 + $0x70] ss:$40 sps:$4 sm:$0xff]   ;;  %v1957_v28 = vmov 0.0   ;;  %s2159_s12 = scalar_lea.vmem [#allocation6], %s1696_s10  ;;  %v297_v29 = vsub.s32 0, %v2148_v26  ;;  %v291_v30 = vld [vmem:[%s2533_s2] sm:$0xff] }
  0x43   : > { %1667 = vmatmul.mubr.msk.bf16.vlgmr.msra.gmra.mrb[0].mxu0 %vm465_vm0, %v2089_v5  ;;  %1669 = vmatmul.mubr.msk.bf16.vlgmr.msra.gmra.mrb[0].mxu1 %vm465_vm0, %v2092_v6  ;;  %260 = vst.msk [vmem:[%s2154_s11 + $0x8] sm:$0x3] %vm2150_vm1, %v1957_v28  ;;  %262 = vst.msk [vmem:[%s2159_s12 + $0x8] sm:$0x3] %vm2150_vm1, %v1957_v28  ;;  %v301_v31 = vsub.s32 1, %v2148_v26  ;;  %v313_v38 = vsub.s32 4, %v2148_v26 }
  0x44   : > { %552 = vmatpush1.bf16.msra.mxu1 %v1783_v7  ;;  %625 = vmatpush1.bf16.msra.mxu0 %v1786_v9  ;;  %v298_v32 = vrot.slane %v291_v30, %v297_v29  ;;  %v1958_v36 = vmov 1966171168   ;;  %v317_v42 = vsub.s32 5, %v2148_v26  ;;  %v305_v49 = vsub.s32 2, %v2148_v26  ;;  %v2184_v63 = vld [vmem:[%s2533_s2 + $0x8] sm:$0x3] }
  0x45   : > { %520 = vmatprep.mubr.bf16.mxu0 %v1956_v0  ;;  %540 = vmatprep.mubr.bf16.mxu1 %v1956_v0  ;;  %v302_v33 = vrot.slane %v291_v30, %v301_v31  ;;  %v1193_v37 = vunpack.c.l.s4 %v1958_v36  ;;  %v309_v50 = vsub.s32 3, %v2148_v26  ;;  %v2175_v53 = vrot.slane %v291_v30, %v313_v38  ;;  %s1697_s24 = smul.u32 160, %s1943_s18  ;;  %s1503_s26 = sshll.u32 %s2154_s11, 4  ;;  %s2447_s26 = int_to_ptr.vmem [resolvable:$true] %s1503_s26 }
  0x46   : > { %553 = vmatprep.subr.bf16.mxu1 %v1793_v12  ;;  %626 = vmatprep.subr.bf16.mxu0 %v1796_v14  ;;  %v321_v54 = vsub.s32 6, %v2148_v26  ;;  %v2178_v57 = vrot.slane %v291_v30, %v317_v42  ;;  %v325_v58 = vsub.s32 7, %v2148_v26  ;;  %v2186_v2 = vrot.slane %v291_v30, %v305_v49  ;;  %s1484_s29 = scalar_lea.sflag [#allocation4], %s2145_s30  ;;  %s1837_s6 = scalar_lea.vmem %s2447_s26, 160 }
  0x47   : > { %v1194_v52 = vunpack.c.0.s8 %v1193_v37  ;;  %v2188_v3 = vrot.slane %v291_v30, %v309_v50  ;;  %s2445_s8 = scalar_lea.hbm %s2534_s3, %s1697_s24  ;;  %p1838_p8 = scmp.ne.s32.totalorder %s2447_s26, %s1837_s6 }
  0x48   : > { %554 = vmatpush1.bf16.msra.mxu1 %v1791_v11  ;;  %627 = vmatpush1.bf16.msra.mxu0 %v1794_v13  ;;  %v2193_v9 = vrot.slane %v291_v30, %v321_v54  ;;  %v2195_v14 = vrot.slane %v291_v30, %v325_v58  ;;  %p2551_p10 = scmp.ne.s32.totalorder %s2540_s25, 0  ;;  %s1959_s9 = smov [#allocation5]  }
  0x49   : > { %697 = vmatprep.subr.bf16.mxu1 %v1799_v16  ;;  %770 = vmatprep.subr.bf16.mxu0 %v1802_v18  ;;  %v2191_v8 = vsub.s32 %v1194_v52, %v2148_v26  ;;  %s1841_s10 = sshll.u32 %s1959_s9, 4  ;;  %s1842_s10 = int_to_ptr.vmem [resolvable:$false] %s1841_s10 }
  0x4a   : > { %p1839_p11 = pnand %p1838_p8, %p2551_p10  ;;  %s1843_s13 = scalar_lea.vmem %s1842_s10, 320 }
  0x4b   : > { %1668 = vmatmul.mubr.msk.bf16.gmra.mrb[4].mxu0 %vm465_vm0, %v1789_v15  ;;  %1670 = vmatmul.mubr.msk.bf16.gmra.mrb[4].mxu1 %vm465_vm0, %v1790_v17  ;;  %p1844_p1 = scmp.lt.s32.totalorder %s2447_s26, %s1842_s10  ;;  %p1845_p3 = scmp.lt.s32.totalorder %s1843_s13, %s1837_s6 }
  0x4c   : > { %583 = vmatprep.mubr.bf16.mxu1 %v1956_v0  ;;  %656 = vmatprep.mubr.bf16.mxu0 %v1956_v0  ;;  %p1840_p13 = pneg %p1839_p11 }
  0x4d   : > { %p1846_p5 = por %p1845_p3, %p1844_p1 }
  0x4f   : > { %p1847_p6 = pnand %p1846_p5, %p1840_p13 }
  0x53   : > { %1671 = vmatmul.mubr.msk.bf16.vlgmr.msra.gmra.mrb[8].mxu1 %vm465_vm0, %v2089_v5  ;;  %1675 = vmatmul.mubr.msk.bf16.vlgmr.msra.gmra.mrb[8].mxu0 %vm465_vm0, %v2089_v5 }
  0x54   : > { %698 = vmatpush1.bf16.msra.mxu1 %v1797_v19  ;;  %771 = vmatpush1.bf16.msra.mxu0 %v1800_v20 }
  0x55   : > { %593 = vmatprep.mubr.bf16.mxu1 %v1956_v0  ;;  %666 = vmatprep.mubr.bf16.mxu0 %v1956_v0 }
  0x56   : > { %699 = vmatprep.subr.bf16.mxu1 %v1805_v21  ;;  %772 = vmatprep.subr.bf16.mxu0 %v1808_v22 }
  0x58   : > { %700 = vmatpush1.bf16.msra.mxu1 %v1803_v23  ;;  %773 = vmatpush1.bf16.msra.mxu0 %v1806_v24 }
  0x5b   : > { %1672 = vmatmul.mubr.msk.bf16.gmra.mrb[12].mxu1 %vm465_vm0, %v1789_v15  ;;  %1676 = vmatmul.mubr.msk.bf16.gmra.mrb[12].mxu0 %vm465_vm0, %v1789_v15 }
  0x5c   : > { %603 = vmatprep.mubr.bf16.mxu1 %v1956_v0  ;;  %676 = vmatprep.mubr.bf16.mxu0 %v1956_v0 }
  0x63   : > { %1673 = vmatmul.mubr.msk.bf16.gmra.mrb[16].mxu1 %vm465_vm0, %v2092_v6  ;;  %1677 = vmatmul.mubr.msk.bf16.gmra.mrb[16].mxu0 %vm465_vm0, %v2092_v6 }
  0x64   : > { %613 = vmatprep.mubr.bf16.mxu1 %v1956_v0  ;;  %686 = vmatprep.mubr.bf16.mxu0 %v1956_v0 }
  0x6b   : > { %1674 = vmatmul.mubr.msk.bf16.gmra.mrb[20].mxu1 %vm465_vm0, %v1790_v17  ;;  %1678 = vmatmul.mubr.msk.bf16.gmra.mrb[20].mxu0 %vm465_vm0, %v1790_v17 }
  0x6c   : > { %729 = vmatprep.mubr.bf16.mxu1 %v1956_v0  ;;  %802 = vmatprep.mubr.bf16.mxu0 %v1956_v0 }
  0x73   : > { %1679 = vmatmul.mubr.msk.bf16.vlgmr.msra.gmra.mrb[24].mxu1 %vm465_vm0, %v2089_v5  ;;  %1683 = vmatmul.mubr.msk.bf16.vlgmr.msra.gmra.mrb[24].mxu0 %vm465_vm0, %v2089_v5 }
  0x74   : > { %739 = vmatprep.mubr.bf16.mxu1 %v1956_v0  ;;  %812 = vmatprep.mubr.bf16.mxu0 %v1956_v0 }
  0x7b   : > { %1680 = vmatmul.mubr.msk.bf16.gmra.mrb[28].mxu1 %vm465_vm0, %v1789_v15  ;;  %1684 = vmatmul.mubr.msk.bf16.gmra.mrb[28].mxu0 %vm465_vm0, %v1789_v15  ;;  %v2198_v15 = vrot.slane %v2184_v63, %v297_v29 }
  0x7c   : > { %749 = vmatprep.mubr.bf16.mxu1 %v1956_v0  ;;  %822 = vmatprep.mubr.bf16.mxu0 %v1956_v0 }
  0x83   : > { %1681 = vmatmul.mubr.msk.bf16.gmra.mrb[32].mxu1 %vm465_vm0, %v2092_v6  ;;  %1685 = vmatmul.mubr.msk.bf16.gmra.mrb[32].mxu0 %vm465_vm0, %v2092_v6 }
  0x84   : > { %759 = vmatprep.mubr.bf16.mxu1 %v1956_v0  ;;  %832 = vmatprep.mubr.bf16.mxu0 %v1956_v0 }
  0x8b   : > { %1682 = vmatmul.mubr.msk.bf16.gmra.mrb[36].mxu1 %vm465_vm0, %v1790_v17  ;;  %1686 = vmatmul.mubr.msk.bf16.gmra.mrb[36].mxu0 %vm465_vm0, %v1790_v17 }
 0x116   : > { %v532_v34 = vpop.f32.mrb[0].mxu1  ;;  %v512_v35 = vpop.f32.mrb[0].mxu0 }
 0x117   : > { %v534_v39 = vpop.f32.mrb[1].mxu1  ;;  %v513_v40 = vadd.f32 %v512_v35, %v298_v32  ;;  %v514_v41 = vpop.f32.mrb[1].mxu0  ;;  %v533_v59 = vadd.f32 %v532_v34, %v298_v32 }
 0x118   : > { %v536_v43 = vpop.f32.mrb[2].mxu1  ;;  %v515_v44 = vadd.f32 %v514_v41, %v302_v33  ;;  %v516_v45 = vpop.f32.mrb[2].mxu0  ;;  %v535_v60 = vadd.f32 %v534_v39, %v302_v33 }
 0x119   : > { %v538_v46 = vpop.f32.mrb[3].mxu1  ;;  %v517_v47 = vadd.f32 %v516_v45, %v298_v32  ;;  %v518_v48 = vpop.f32.mrb[3].mxu0  ;;  %v843_v55 = vmax.f32 %v513_v40, 0.0  ;;  %v537_v10 = vadd.f32 %v536_v43, %v298_v32  ;;  %v883_v16 = vmax.f32 %v533_v59, 0.0 }
 0x11a   : > { %v519_v51 = vadd.f32 %v518_v48, %v302_v33  ;;  %v844_v61 = vmax.f32 %v515_v44, 0.0  ;;  %v884_v17 = vmax.f32 %v535_v60, 0.0  ;;  %v539_v18 = vadd.f32 %v538_v46, %v302_v33 }
 0x11b   : > { %v853_v56 = vmax.f32 %v517_v47, 0.0  ;;  %v893_v38 = vmax.f32 %v537_v10, 0.0 }
 0x11c   : > { %v854_v62 = vmax.f32 %v519_v51, 0.0  ;;  %v894_v41 = vmax.f32 %v539_v18, 0.0 }
 0x11d   : > { %v1048_v0 = vmax.f32 %v843_v55, %v853_v56  ;;  %v1264_v1 = vadd.f32 %v853_v56, %v843_v55 }
 0x11e   : > { %v1061_v4 = vmax.f32 %v844_v61, %v854_v62  ;;  %v1277_v5 = vadd.f32 %v854_v62, %v844_v61  ;;  %v522_v6 = vpop.f32.mrb[4].mxu0  ;;  %v542_v7 = vpop.f32.mrb[4].mxu1 }
 0x11f   : > { %v523_v11 = vadd.f32 %v522_v6, %v298_v32  ;;  %v524_v12 = vpop.f32.mrb[5].mxu0  ;;  %v544_v13 = vpop.f32.mrb[5].mxu1  ;;  %v543_v23 = vadd.f32 %v542_v7, %v298_v32 }
 0x120   : > { %v525_v19 = vadd.f32 %v524_v12, %v302_v33  ;;  %v526_v20 = vpop.f32.mrb[6].mxu0  ;;  %v546_v21 = vpop.f32.mrb[6].mxu1  ;;  %v545_v24 = vadd.f32 %v544_v13, %v302_v33 }
 0x121   : > { %v863_v22 = vmax.f32 %v523_v11, 0.0  ;;  %v527_v25 = vadd.f32 %v526_v20, %v298_v32  ;;  %v528_v28 = vpop.f32.mrb[7].mxu0  ;;  %v548_v34 = vpop.f32.mrb[7].mxu1  ;;  %v547_v36 = vadd.f32 %v546_v21, %v298_v32  ;;  %v903_v45 = vmax.f32 %v543_v23, 0.0 }
 0x122   : > { %v864_v35 = vmax.f32 %v525_v19, 0.0  ;;  %v529_v37 = vadd.f32 %v528_v28, %v302_v33  ;;  %v549_v30 = vadd.f32 %v548_v34, %v302_v33  ;;  %v904_v46 = vmax.f32 %v545_v24, 0.0 }
 0x123   : > { %v1049_v39 = vmax.f32 %v1048_v0, %v863_v22  ;;  %v1265_v29 = vadd.f32 %v1264_v1, %v863_v22  ;;  %v873_v40 = vmax.f32 %v527_v25, 0.0  ;;  %v913_v49 = vmax.f32 %v547_v36, 0.0 }
 0x124   : > { %v1062_v42 = vmax.f32 %v1061_v4, %v864_v35  ;;  %v1278_v43 = vadd.f32 %v1277_v5, %v864_v35  ;;  %v874_v44 = vmax.f32 %v529_v37, 0.0  ;;  %v914_v52 = vmax.f32 %v549_v30, 0.0 }
 0x125   : > { %v1050_v47 = vmax.f32 %v1049_v39, %v873_v40  ;;  %v1266_v48 = vadd.f32 %v1265_v29, %v873_v40 }
 0x126   : > { %v1063_v50 = vmax.f32 %v1062_v42, %v874_v44  ;;  %v1279_v51 = vadd.f32 %v1278_v43, %v874_v44  ;;  %v585_v54 = vpop.f32.mrb[8].mxu1  ;;  %v658_v32 = vpop.f32.mrb[8].mxu0 }
 0x127   : > { %v1051_v55 = vmax.f32 %v1050_v47, %v883_v16  ;;  %v1267_v33 = vadd.f32 %v1266_v48, %v883_v16  ;;  %v586_v56 = vadd.f32 %v585_v54, %v2186_v2  ;;  %v587_v58 = vpop.f32.mrb[9].mxu1  ;;  %v659_v59 = vadd.f32 %v658_v32, %v2175_v53  ;;  %v660_v60 = vpop.f32.mrb[9].mxu0 }
 0x128   : > { %v1064_v61 = vmax.f32 %v1063_v50, %v884_v17  ;;  %v1280_v62 = vadd.f32 %v1279_v51, %v884_v17  ;;  %v588_v0 = vadd.f32 %v587_v58, %v2188_v3  ;;  %v589_v1 = vpop.f32.mrb[10].mxu1  ;;  %v661_v4 = vadd.f32 %v660_v60, %v2178_v57  ;;  %v662_v5 = vpop.f32.mrb[10].mxu0 }
 0x129   : > { %v1052_v6 = vmax.f32 %v1051_v55, %v893_v38  ;;  %v1268_v7 = vadd.f32 %v1267_v33, %v893_v38  ;;  %v845_v10 = vmax.f32 %v586_v56, 0.0  ;;  %v590_v11 = vadd.f32 %v589_v1, %v2186_v2  ;;  %v591_v12 = vpop.f32.mrb[11].mxu1  ;;  %v664_v13 = vpop.f32.mrb[11].mxu0 }
 0x12a   : > { %v1065_v16 = vmax.f32 %v1064_v61, %v894_v41  ;;  %v1281_v18 = vadd.f32 %v1280_v62, %v894_v41  ;;  %v846_v19 = vmax.f32 %v588_v0, 0.0  ;;  %v847_v20 = vmax.f32 %v659_v59, 0.0 }
 0x12b   : > { %v1053_v21 = vmax.f32 %v1052_v6, %v903_v45  ;;  %v1269_v22 = vadd.f32 %v1268_v7, %v903_v45  ;;  %v855_v17 = vmax.f32 %v590_v11, 0.0  ;;  %v592_v23 = vadd.f32 %v591_v12, %v2188_v3 }
 0x12c   : > { %v1066_v24 = vmax.f32 %v1065_v16, %v904_v46  ;;  %v1282_v25 = vadd.f32 %v1281_v18, %v904_v46  ;;  %v848_v28 = vmax.f32 %v661_v4, 0.0  ;;  %v663_v34 = vadd.f32 %v662_v5, %v2175_v53 }
 0x12d   : > { %v1054_v35 = vmax.f32 %v1053_v21, %v913_v49  ;;  %v1270_v36 = vadd.f32 %v1269_v22, %v913_v49  ;;  %v1074_v37 = vmax.f32 %v845_v10, %v855_v17  ;;  %v1290_v30 = vadd.f32 %v855_v17, %v845_v10 }
 0x12e   : > { %v1067_v38 = vmax.f32 %v1066_v24, %v914_v52  ;;  %v1283_v39 = vadd.f32 %v1282_v25, %v914_v52  ;;  %v856_v29 = vmax.f32 %v592_v23, 0.0  ;;  %v857_v40 = vmax.f32 %v663_v34, 0.0  ;;  %v595_v41 = vpop.f32.mrb[12].mxu1  ;;  %v668_v42 = vpop.f32.mrb[12].mxu0 }
 0x12f   : > { %v1055_v43 = vrot.slane %v1054_v35, 4  ;;  %v1271_v44 = vrot.slane %v1270_v36, 4  ;;  %v665_v45 = vadd.f32 %v664_v13, %v2178_v57  ;;  %v596_v47 = vadd.f32 %v595_v41, %v2186_v2  ;;  %v597_v46 = vpop.f32.mrb[13].mxu1  ;;  %v670_v48 = vpop.f32.mrb[13].mxu0 }
 0x130   : > { %v1068_v50 = vrot.slane %v1067_v38, 4  ;;  %v1284_v51 = vrot.slane %v1283_v39, 4  ;;  %v1087_v54 = vmax.f32 %v846_v19, %v856_v29  ;;  %v1303_v49 = vadd.f32 %v856_v29, %v846_v19  ;;  %v599_v32 = vpop.f32.mrb[14].mxu1  ;;  %v672_v55 = vpop.f32.mrb[14].mxu0 }
 0x131   : > { %v1056_v33 = vmax.f32 %v1054_v35, %v1055_v43  ;;  %v1272_v52 = vadd.f32 %v1271_v44, %v1270_v36  ;;  %v1100_v56 = vmax.f32 %v847_v20, %v857_v40  ;;  %v1316_v58 = vadd.f32 %v857_v40, %v847_v20  ;;  %v601_v59 = vpop.f32.mrb[15].mxu1  ;;  %v674_v60 = vpop.f32.mrb[15].mxu0 }
 0x132   : > { %v1069_v61 = vmax.f32 %v1067_v38, %v1068_v50  ;;  %v1285_v62 = vadd.f32 %v1284_v51, %v1283_v39  ;;  %v858_v0 = vmax.f32 %v665_v45, 0.0  ;;  %v865_v1 = vmax.f32 %v596_v47, 0.0 }
 0x133   : > { %v1057_v4 = vrot.slane %v1056_v33, 2  ;;  %v1273_v5 = vrot.slane %v1272_v52, 2  ;;  %v669_v6 = vadd.f32 %v668_v42, %v2175_v53  ;;  %v598_v7 = vadd.f32 %v597_v46, %v2188_v3 }
 0x134   : > { %v1070_v10 = vrot.slane %v1069_v61, 2  ;;  %v1286_v11 = vrot.slane %v1285_v62, 2  ;;  %v1113_v12 = vmax.f32 %v848_v28, %v858_v0  ;;  %v1329_v13 = vadd.f32 %v858_v0, %v848_v28 }
 0x135   : > { %v1058_v16 = vmax.f32 %v1056_v33, %v1057_v4  ;;  %v1274_v18 = vadd.f32 %v1273_v5, %v1272_v52  ;;  %v1075_v19 = vmax.f32 %v1074_v37, %v865_v1  ;;  %v1291_v20 = vadd.f32 %v1290_v30, %v865_v1 }
 0x136   : > { %v1071_v21 = vmax.f32 %v1069_v61, %v1070_v10  ;;  %v1287_v22 = vadd.f32 %v1286_v11, %v1285_v62  ;;  %v867_v17 = vmax.f32 %v669_v6, 0.0  ;;  %v866_v23 = vmax.f32 %v598_v7, 0.0  ;;  %v605_v24 = vpop.f32.mrb[16].mxu1  ;;  %v678_v25 = vpop.f32.mrb[16].mxu0 }
 0x137   : > { %v1059_v34 = vrot.slane %v1058_v16, 1  ;;  %v1275_v35 = vrot.slane %v1274_v18, 1  ;;  %v671_v36 = vadd.f32 %v670_v48, %v2178_v57  ;;  %v600_v38 = vadd.f32 %v599_v32, %v2186_v2  ;;  %v607_v39 = vpop.f32.mrb[17].mxu1  ;;  %v680_v29 = vpop.f32.mrb[17].mxu0 }
 0x138   : > { %v1072_v40 = vrot.slane %v1071_v21, 1  ;;  %v1288_v28 = vrot.slane %v1287_v22, 1  ;;  %v1101_v41 = vmax.f32 %v1100_v56, %v867_v17  ;;  %v1317_v42 = vadd.f32 %v1316_v58, %v867_v17  ;;  %v609_v37 = vpop.f32.mrb[18].mxu1  ;;  %v682_v30 = vpop.f32.mrb[18].mxu0 }
 0x139   : > { %v1060_v43 = vmax.f32 %v1058_v16, %v1059_v34  ;;  %v2213_v44 = vadd.f32 %v1275_v35, %v1274_v18  ;;  %v1088_v45 = vmax.f32 %v1087_v54, %v866_v23  ;;  %v1304_v47 = vadd.f32 %v1303_v49, %v866_v23  ;;  %v611_v46 = vpop.f32.mrb[19].mxu1  ;;  %v684_v50 = vpop.f32.mrb[19].mxu0 }
 0x13a   : > { %v1073_v51 = vmax.f32 %v1071_v21, %v1072_v40  ;;  %v2215_v33 = vadd.f32 %v1288_v28, %v1287_v22  ;;  %v868_v48 = vmax.f32 %v671_v36, 0.0  ;;  %v875_v32 = vmax.f32 %v600_v38, 0.0 }
 0x13b   : > { %v673_v52 = vadd.f32 %v672_v55, %v2175_v53  ;;  %v602_v61 = vadd.f32 %v601_v59, %v2188_v3  ;;  %v675_v56 = vadd.f32 %v674_v60, %v2178_v57  ;;  %v606_v58 = vadd.f32 %v605_v24, %v2186_v2 }
 0x13c   : > { %v1188_v62 = vcombine.low %v1060_v43, %v1073_v51  ;;  %v1404_v54 = vcombine.low %v2213_v44, %v2215_v33  ;;  %v1114_v49 = vmax.f32 %v1113_v12, %v868_v48  ;;  %v1330_v0 = vadd.f32 %v1329_v13, %v868_v48 }
 0x13d   : > { %v1076_v1 = vmax.f32 %v1075_v19, %v875_v32  ;;  %v1292_v4 = vadd.f32 %v1291_v20, %v875_v32  ;;  %v877_v5 = vmax.f32 %v673_v52, 0.0  ;;  %v876_v6 = vmax.f32 %v602_v61, 0.0 }
 0x13e   : > { %v2224_v7 = vrot.slane %v1188_v62, %v2191_v8  ;;  %v878_v55 = vmax.f32 %v675_v56, 0.0  ;;  %v885_v10 = vmax.f32 %v606_v58, 0.0  ;;  %v615_v59 = vpop.f32.mrb[20].mxu1  ;;  %v688_v11 = vpop.f32.mrb[20].mxu0  ;;  %v2229_v60 = vrot.slane %v2184_v63, %v301_v31 }
 0x13f   : > { %v1102_v16 = vmax.f32 %v1101_v41, %v877_v5  ;;  %v1318_v18 = vadd.f32 %v1317_v42, %v877_v5  ;;  %v1089_v12 = vmax.f32 %v1088_v45, %v876_v6  ;;  %v1305_v13 = vadd.f32 %v1304_v47, %v876_v6  ;;  %v617_v19 = vpop.f32.mrb[21].mxu1  ;;  %v690_v20 = vpop.f32.mrb[21].mxu0 }
 0x140   : > { %v1115_v21 = vmax.f32 %v1114_v49, %v878_v55  ;;  %v1331_v22 = vadd.f32 %v1330_v0, %v878_v55  ;;  %v1077_v17 = vmax.f32 %v1076_v1, %v885_v10  ;;  %v1293_v23 = vadd.f32 %v1292_v4, %v885_v10  ;;  %v619_v24 = vpop.f32.mrb[22].mxu1  ;;  %v692_v34 = vpop.f32.mrb[22].mxu0 }
 0x141   : > { %v679_v35 = vadd.f32 %v678_v25, %v2175_v53  ;;  %v608_v36 = vadd.f32 %v607_v39, %v2188_v3  ;;  %v681_v26 = vadd.f32 %v680_v29, %v2178_v57  ;;  %v610_v31 = vadd.f32 %v609_v37, %v2186_v2  ;;  %v621_v63 = vpop.f32.mrb[23].mxu1  ;;  %v694_v38 = vpop.f32.mrb[23].mxu0 }
 0x142   : > { %v683_v40 = vadd.f32 %v682_v30, %v2175_v53  ;;  %v612_v28 = vadd.f32 %v611_v46, %v2188_v3  ;;  %v685_v41 = vadd.f32 %v684_v50, %v2178_v57  ;;  %v616_v42 = vadd.f32 %v615_v59, %v2186_v2 }
 0x143   : > { %v887_v43 = vmax.f32 %v679_v35, 0.0  ;;  %v886_v45 = vmax.f32 %v608_v36, 0.0  ;;  %v888_v47 = vmax.f32 %v681_v26, 0.0  ;;  %v895_v25 = vmax.f32 %v610_v31, 0.0 }
 0x144   : > { %v897_v51 = vmax.f32 %v683_v40, 0.0  ;;  %v896_v39 = vmax.f32 %v612_v28, 0.0  ;;  %v898_v48 = vmax.f32 %v685_v41, 0.0  ;;  %v905_v29 = vmax.f32 %v616_v42, 0.0 }
 0x145   : > { %v1103_v32 = vmax.f32 %v1102_v16, %v887_v43  ;;  %v1319_v37 = vadd.f32 %v1318_v18, %v887_v43  ;;  %v1090_v52 = vmax.f32 %v1089_v12, %v886_v45  ;;  %v1306_v61 = vadd.f32 %v1305_v13, %v886_v45 }
 0x146   : > { %v1116_v56 = vmax.f32 %v1115_v21, %v888_v47  ;;  %v1332_v30 = vadd.f32 %v1331_v22, %v888_v47  ;;  %v1078_v58 = vmax.f32 %v1077_v17, %v895_v25  ;;  %v1294_v46 = vadd.f32 %v1293_v23, %v895_v25  ;;  %v731_v62 = vpop.f32.mrb[24].mxu1  ;;  %v2239_v50 = vpop.f32.mrb[24].mxu0 }
 0x147   : > { %v1104_v49 = vmax.f32 %v1103_v32, %v897_v51  ;;  %v1320_v0 = vadd.f32 %v1319_v37, %v897_v51  ;;  %v1091_v1 = vmax.f32 %v1090_v52, %v896_v39  ;;  %v1307_v4 = vadd.f32 %v1306_v61, %v896_v39  ;;  %v2241_v5 = vpop.f32.mrb[25].mxu1  ;;  %v2243_v6 = vpop.f32.mrb[25].mxu0 }
 0x148   : > { %v1117_v55 = vmax.f32 %v1116_v56, %v898_v48  ;;  %v1333_v10 = vadd.f32 %v1332_v30, %v898_v48  ;;  %v1079_v59 = vmax.f32 %v1078_v58, %v905_v29  ;;  %v1295_v16 = vadd.f32 %v1294_v46, %v905_v29  ;;  %v2245_v18 = vpop.f32.mrb[26].mxu1  ;;  %v2247_v12 = vpop.f32.mrb[26].mxu0 }
 0x149   : > { %v689_v13 = vadd.f32 %v688_v11, %v2175_v53  ;;  %v618_v21 = vadd.f32 %v617_v19, %v2188_v3  ;;  %v691_v22 = vadd.f32 %v690_v20, %v2178_v57  ;;  %v620_v17 = vadd.f32 %v619_v24, %v2186_v2  ;;  %v2253_v23 = vpop.f32.mrb[27].mxu1  ;;  %v2255_v35 = vpop.f32.mrb[27].mxu0 }
 0x14a   : > { %v693_v36 = vadd.f32 %v692_v34, %v2175_v53  ;;  %v622_v26 = vadd.f32 %v621_v63, %v2188_v3  ;;  %v695_v31 = vadd.f32 %v694_v38, %v2178_v57  ;;  %v2261_v40 = vadd.f32 %v731_v62, %v2193_v9 }
 0x14b   : > { %v907_v11 = vmax.f32 %v689_v13, 0.0  ;;  %v906_v28 = vmax.f32 %v618_v21, 0.0  ;;  %v908_v19 = vmax.f32 %v691_v22, 0.0  ;;  %v915_v41 = vmax.f32 %v620_v17, 0.0 }
 0x14c   : > { %v917_v20 = vmax.f32 %v693_v36, 0.0  ;;  %v916_v42 = vmax.f32 %v622_v26, 0.0  ;;  %v918_v2 = vmax.f32 %v695_v31, 0.0  ;;  %v849_v24 = vmax.f32 %v2261_v40, 0.0 }
 0x14d   : > { %v1105_v43 = vmax.f32 %v1104_v49, %v907_v11  ;;  %v1321_v45 = vadd.f32 %v1320_v0, %v907_v11  ;;  %v1092_v47 = vmax.f32 %v1091_v1, %v906_v28  ;;  %v1308_v53 = vadd.f32 %v1307_v4, %v906_v28 }
 0x14e   : > { %v1118_v34 = vmax.f32 %v1117_v55, %v908_v19  ;;  %v1334_v3 = vadd.f32 %v1333_v10, %v908_v19  ;;  %v1080_v63 = vmax.f32 %v1079_v59, %v915_v41  ;;  %v1296_v57 = vadd.f32 %v1295_v16, %v915_v41  ;;  %v2264_v38 = vpop.f32.mrb[28].mxu1  ;;  %v2266_v25 = vpop.f32.mrb[28].mxu0 }
 0x14f   : > { %v1106_v51 = vmax.f32 %v1105_v43, %v917_v20  ;;  %v1322_v39 = vadd.f32 %v1321_v45, %v917_v20  ;;  %v1093_v48 = vmax.f32 %v1092_v47, %v916_v42  ;;  %v1309_v29 = vadd.f32 %v1308_v53, %v916_v42  ;;  %v2268_v32 = vpop.f32.mrb[29].mxu1  ;;  %v2270_v37 = vpop.f32.mrb[29].mxu0 }
 0x150   : > { %v1081_v52 = vrot.slane %v1080_v63, 4  ;;  %v1297_v61 = vrot.slane %v1296_v57, 4  ;;  %v1119_v56 = vmax.f32 %v1118_v34, %v918_v2  ;;  %v1335_v30 = vadd.f32 %v1334_v3, %v918_v2  ;;  %v2272_v58 = vpop.f32.mrb[30].mxu1  ;;  %v2274_v46 = vpop.f32.mrb[30].mxu0 }
 0x151   : > { %v1107_v62 = vrot.slane %v1106_v51, 4  ;;  %v1323_v49 = vrot.slane %v1322_v39, 4  ;;  %v1094_v0 = vrot.slane %v1093_v48, 4  ;;  %v1310_v1 = vrot.slane %v1309_v29, 4  ;;  %v2276_v4 = vpop.f32.mrb[31].mxu1  ;;  %v2278_v55 = vpop.f32.mrb[31].mxu0 }
 0x152   : > { %v1082_v10 = vmax.f32 %v1080_v63, %v1081_v52  ;;  %v1298_v59 = vadd.f32 %v1297_v61, %v1296_v57  ;;  %v1120_v16 = vrot.slane %v1119_v56, 4  ;;  %v1336_v13 = vrot.slane %v1335_v30, 4 }
 0x153   : > { %v1108_v21 = vmax.f32 %v1106_v51, %v1107_v62  ;;  %v1324_v22 = vadd.f32 %v1323_v49, %v1322_v39  ;;  %v1095_v17 = vmax.f32 %v1093_v48, %v1094_v0  ;;  %v1311_v36 = vadd.f32 %v1310_v1, %v1309_v29 }
 0x154   : > { %v1083_v26 = vrot.slane %v1082_v10, 2  ;;  %v1299_v31 = vrot.slane %v1298_v59, 2  ;;  %v1121_v11 = vmax.f32 %v1119_v56, %v1120_v16  ;;  %v1337_v28 = vadd.f32 %v1336_v13, %v1335_v30 }
 0x155   : > { %v1109_v19 = vrot.slane %v1108_v21, 2  ;;  %v1325_v41 = vrot.slane %v1324_v22, 2  ;;  %v1096_v20 = vrot.slane %v1095_v17, 2  ;;  %v1312_v42 = vrot.slane %v1311_v36, 2 }
 0x156   : > { %v1084_v2 = vmax.f32 %v1082_v10, %v1083_v26  ;;  %v1300_v43 = vadd.f32 %v1299_v31, %v1298_v59  ;;  %v1122_v45 = vrot.slane %v1121_v11, 2  ;;  %v1338_v47 = vrot.slane %v1337_v28, 2  ;;  %v2280_v53 = vpop.f32.mrb[32].mxu1  ;;  %v2282_v34 = vpop.f32.mrb[32].mxu0 }
 0x157   : > { %v1110_v3 = vmax.f32 %v1108_v21, %v1109_v19  ;;  %v1326_v63 = vadd.f32 %v1325_v41, %v1324_v22  ;;  %v1097_v57 = vmax.f32 %v1095_v17, %v1096_v20  ;;  %v1313_v51 = vadd.f32 %v1312_v42, %v1311_v36  ;;  %v2284_v39 = vpop.f32.mrb[33].mxu1  ;;  %v2286_v48 = vpop.f32.mrb[33].mxu0 }
 0x158   : > { %v1085_v29 = vrot.slane %v1084_v2, 1  ;;  %v1301_v52 = vrot.slane %v1300_v43, 1  ;;  %v1123_v61 = vmax.f32 %v1121_v11, %v1122_v45  ;;  %v1339_v56 = vadd.f32 %v1338_v47, %v1337_v28  ;;  %v2288_v30 = vpop.f32.mrb[34].mxu1  ;;  %v2290_v62 = vpop.f32.mrb[34].mxu0 }
 0x159   : > { %v1111_v49 = vrot.slane %v1110_v3, 1  ;;  %v1327_v0 = vrot.slane %v1326_v63, 1  ;;  %v1098_v1 = vrot.slane %v1097_v57, 1  ;;  %v1314_v10 = vrot.slane %v1313_v51, 1  ;;  %v2292_v59 = vpop.f32.mrb[35].mxu1  ;;  %v2294_v16 = vpop.f32.mrb[35].mxu0 }
 0x15a   : > { %v1086_v13 = vmax.f32 %v1084_v2, %v1085_v29  ;;  %v1302_v21 = vadd.f32 %v1301_v52, %v1300_v43  ;;  %v1124_v22 = vrot.slane %v1123_v61, 1  ;;  %v1340_v17 = vrot.slane %v1339_v56, 1 }
 0x15b   : > { %v2296_v36 = vmax.f32 %v1110_v3, %v1111_v49  ;;  %v2298_v26 = vadd.f32 %v1327_v0, %v1326_v63  ;;  %v1099_v31 = vmax.f32 %v1097_v57, %v1098_v1  ;;  %v1315_v11 = vadd.f32 %v1314_v10, %v1313_v51 }
 0x15c   : > { %v2300_v28 = vmax.f32 %v1123_v61, %v1124_v22  ;;  %v2302_v19 = vadd.f32 %v1340_v17, %v1339_v56  ;;  %v734_v41 = vadd.f32 %v2241_v5, %v2195_v14  ;;  %v736_v20 = vadd.f32 %v2245_v18, %v2193_v9 }
 0x15d   : > { %v2312_v42 = vrot.slane %v1404_v54, %v2191_v8  ;;  %v1189_v2 = vcombine.low %v1086_v13, %v1099_v31  ;;  %v1405_v43 = vcombine.low %v1302_v21, %v1315_v11  ;;  %v738_v45 = vadd.f32 %v2253_v23, %v2195_v14 }
 0x15e   : > { %v1190_v47 = vcombine.low %v2296_v36, %v2300_v28  ;;  %v1406_v5 = vcombine.low %v2298_v26, %v2302_v19  ;;  %v850_v3 = vmax.f32 %v734_v41, 0.0  ;;  %v859_v63 = vmax.f32 %v736_v20, 0.0  ;;  %v2320_v18 = vpop.f32.mrb[36].mxu1  ;;  %v2322_v57 = vpop.f32.mrb[36].mxu0  ;;  %v1047_v36 = vld [vmem:[%s2154_s11 + $0x8] sm:$0x3] }
 0x15f   : > { %v2325_v44 = vrot.slane %v1189_v2, %v2191_v8  ;;  %v2328_v33 = vrot.slane %v1405_v43, %v2191_v8  ;;  %v805_v54 = vadd.f32 %v2239_v50, %v2198_v15  ;;  %v860_v23 = vmax.f32 %v738_v45, 0.0  ;;  %v2332_v51 = vpop.f32.mrb[37].mxu1  ;;  %v2334_v29 = vpop.f32.mrb[37].mxu0  ;;  %v1263_v28 = vld [vmem:[%s2159_s12 + $0x8] sm:$0x3] }
 0x160   : > { %v1126_v52 = vmax.f32 %v849_v24, %v859_v63  ;;  %v1342_v61 = vadd.f32 %v859_v63, %v849_v24  ;;  %v2340_v56 = vpop.f32.mrb[38].mxu1  ;;  %v2342_v49 = vpop.f32.mrb[38].mxu0  ;;  %v807_v40 = vadd.f32 %v2243_v6, %v2229_v60  ;;  %v809_v24 = vadd.f32 %v2247_v12, %v2198_v15 }
 0x161   : > { %v1139_v1 = vmax.f32 %v850_v3, %v860_v23  ;;  %v1355_v10 = vadd.f32 %v860_v23, %v850_v3  ;;  %v2348_v13 = vpop.f32.mrb[39].mxu1  ;;  %v2350_v21 = vpop.f32.mrb[39].mxu0  ;;  %v811_v22 = vadd.f32 %v2255_v35, %v2229_v60  ;;  %v742_v17 = vadd.f32 %v2264_v38, %v2193_v9 }
 0x162   : > { %v851_v31 = vmax.f32 %v805_v54, 0.0  ;;  %v815_v11 = vadd.f32 %v2266_v25, %v2198_v15  ;;  %v744_v41 = vadd.f32 %v2268_v32, %v2195_v14  ;;  %v852_v20 = vmax.f32 %v807_v40, 0.0 }
 0x163   : > { %v861_v2 = vmax.f32 %v809_v24, 0.0  ;;  %v862_v43 = vmax.f32 %v811_v22, 0.0  ;;  %v869_v6 = vmax.f32 %v742_v17, 0.0  ;;  %v817_v12 = vadd.f32 %v2270_v37, %v2229_v60 }
 0x164   : > { %v871_v45 = vmax.f32 %v815_v11, 0.0  ;;  %v870_v3 = vmax.f32 %v744_v41, 0.0  ;;  %v746_v35 = vadd.f32 %v2272_v58, %v2193_v9  ;;  %v819_v11 = vadd.f32 %v2274_v46, %v2198_v15 }
 0x165   : > { %v1152_v38 = vmax.f32 %v851_v31, %v861_v2  ;;  %v1368_v63 = vadd.f32 %v861_v2, %v851_v31  ;;  %v1165_v54 = vmax.f32 %v852_v20, %v862_v43  ;;  %v1381_v23 = vadd.f32 %v862_v43, %v852_v20 }
 0x166   : > { %v1127_v25 = vmax.f32 %v1126_v52, %v869_v6  ;;  %v1343_v50 = vadd.f32 %v1342_v61, %v869_v6  ;;  %v1140_v0 = vmax.f32 %v1139_v1, %v870_v3  ;;  %v1356_v32 = vadd.f32 %v1355_v10, %v870_v3 }
 0x167   : > { %v1153_v40 = vmax.f32 %v1152_v38, %v871_v45  ;;  %v1369_v24 = vadd.f32 %v1368_v63, %v871_v45  ;;  %v872_v22 = vmax.f32 %v817_v12, 0.0  ;;  %v879_v17 = vmax.f32 %v746_v35, 0.0 }
 0x168   : > { %v748_v37 = vadd.f32 %v2276_v4, %v2195_v14  ;;  %v821_v58 = vadd.f32 %v2278_v55, %v2229_v60  ;;  %v752_v31 = vadd.f32 %v2280_v53, %v2193_v9  ;;  %v881_v41 = vmax.f32 %v819_v11, 0.0 }
 0x169   : > { %v1166_v52 = vmax.f32 %v1165_v54, %v872_v22  ;;  %v1382_v61 = vadd.f32 %v1381_v23, %v872_v22  ;;  %v1128_v1 = vmax.f32 %v1127_v25, %v879_v17  ;;  %v1344_v10 = vadd.f32 %v1343_v50, %v879_v17 }
 0x16a   : > { %v880_v20 = vmax.f32 %v748_v37, 0.0  ;;  %v882_v2 = vmax.f32 %v821_v58, 0.0  ;;  %v889_v43 = vmax.f32 %v752_v31, 0.0  ;;  %v825_v46 = vadd.f32 %v2282_v34, %v2198_v15 }
 0x16b   : > { %v754_v4 = vadd.f32 %v2284_v39, %v2195_v14  ;;  %v827_v55 = vadd.f32 %v2286_v48, %v2229_v60  ;;  %v756_v53 = vadd.f32 %v2288_v30, %v2193_v9  ;;  %v1154_v6 = vmax.f32 %v1153_v40, %v881_v41 }
 0x16c   : > { %v1370_v45 = vadd.f32 %v1369_v24, %v881_v41  ;;  %v1141_v3 = vmax.f32 %v1140_v0, %v880_v20  ;;  %v1357_v50 = vadd.f32 %v1356_v32, %v880_v20  ;;  %v1167_v12 = vmax.f32 %v1166_v52, %v882_v2 }
 0x16d   : > { %v1383_v35 = vadd.f32 %v1382_v61, %v882_v2  ;;  %v1129_v38 = vmax.f32 %v1128_v1, %v889_v43  ;;  %v1345_v63 = vadd.f32 %v1344_v10, %v889_v43  ;;  %v891_v54 = vmax.f32 %v825_v46, 0.0 }
 0x16e   : > { %v890_v23 = vmax.f32 %v754_v4, 0.0  ;;  %v892_v34 = vmax.f32 %v827_v55, 0.0  ;;  %v899_v25 = vmax.f32 %v756_v53, 0.0  ;;  %v829_v39 = vadd.f32 %v2290_v62, %v2198_v15 }
 0x16f   : > { %v758_v48 = vadd.f32 %v2292_v59, %v2195_v14  ;;  %v831_v30 = vadd.f32 %v2294_v16, %v2229_v60  ;;  %v762_v0 = vadd.f32 %v2320_v18, %v2193_v9  ;;  %v1155_v32 = vmax.f32 %v1154_v6, %v891_v54 }
 0x170   : > { %v1371_v40 = vadd.f32 %v1370_v45, %v891_v54  ;;  %v1142_v24 = vmax.f32 %v1141_v3, %v890_v23  ;;  %v1358_v22 = vadd.f32 %v1357_v50, %v890_v23  ;;  %v1168_v17 = vmax.f32 %v1167_v12, %v892_v34 }
 0x171   : > { %v1384_v11 = vadd.f32 %v1383_v35, %v892_v34  ;;  %v1130_v37 = vmax.f32 %v1129_v38, %v899_v25  ;;  %v1346_v58 = vadd.f32 %v1345_v63, %v899_v25  ;;  %v901_v31 = vmax.f32 %v829_v39, 0.0 }
 0x172   : > { %v900_v52 = vmax.f32 %v758_v48, 0.0  ;;  %v902_v62 = vmax.f32 %v831_v30, 0.0  ;;  %v909_v61 = vmax.f32 %v762_v0, 0.0  ;;  %v835_v59 = vadd.f32 %v2322_v57, %v2198_v15 }
 0x173   : > { %v764_v16 = vadd.f32 %v2332_v51, %v2195_v14  ;;  %v837_v18 = vadd.f32 %v2334_v29, %v2229_v60  ;;  %v766_v1 = vadd.f32 %v2340_v56, %v2193_v9  ;;  %v1156_v10 = vmax.f32 %v1155_v32, %v901_v31 }
 0x174   : > { %v1372_v41 = vadd.f32 %v1371_v40, %v901_v31  ;;  %v1143_v20 = vmax.f32 %v1142_v24, %v900_v52  ;;  %v1359_v2 = vadd.f32 %v1358_v22, %v900_v52  ;;  %v1169_v43 = vmax.f32 %v1168_v17, %v902_v62 }
 0x175   : > { %v1385_v46 = vadd.f32 %v1384_v11, %v902_v62  ;;  %v1131_v4 = vmax.f32 %v1130_v37, %v909_v61  ;;  %v1347_v55 = vadd.f32 %v1346_v58, %v909_v61  ;;  %v911_v53 = vmax.f32 %v835_v59, 0.0 }
 0x176   : > { %v910_v6 = vmax.f32 %v764_v16, 0.0  ;;  %v912_v57 = vmax.f32 %v837_v18, 0.0  ;;  %v919_v45 = vmax.f32 %v766_v1, 0.0  ;;  %v839_v51 = vadd.f32 %v2342_v49, %v2198_v15 }
 0x177   : > { %v768_v29 = vadd.f32 %v2348_v13, %v2195_v14  ;;  %v841_v9 = vadd.f32 %v2350_v21, %v2229_v60  ;;  %v1157_v56 = vmax.f32 %v1156_v10, %v911_v53  ;;  %v1373_v3 = vadd.f32 %v1372_v41, %v911_v53 }
 0x178   : > { %v1144_v50 = vmax.f32 %v1143_v20, %v910_v6  ;;  %v1360_v12 = vadd.f32 %v1359_v2, %v910_v6  ;;  %v1170_v35 = vmax.f32 %v1169_v43, %v912_v57  ;;  %v1386_v38 = vadd.f32 %v1385_v46, %v912_v57 }
 0x179   : > { %v1132_v63 = vmax.f32 %v1131_v4, %v919_v45  ;;  %v1348_v54 = vadd.f32 %v1347_v55, %v919_v45  ;;  %v921_v23 = vmax.f32 %v839_v51, 0.0  ;;  %v920_v34 = vmax.f32 %v768_v29, 0.0 }
 0x17a   : > { %v922_v25 = vmax.f32 %v841_v9, 0.0 }
 0x17b   : > { %v1133_v39 = vrot.slane %v1132_v63, 4  ;;  %v1349_v48 = vrot.slane %v1348_v54, 4  ;;  %v1158_v15 = vmax.f32 %v1157_v56, %v921_v23  ;;  %v1374_v49 = vadd.f32 %v1373_v3, %v921_v23 }
 0x17c   : > { %v1145_v30 = vmax.f32 %v1144_v50, %v920_v34  ;;  %v1361_v14 = vadd.f32 %v1360_v12, %v920_v34  ;;  %v1171_v60 = vmax.f32 %v1170_v35, %v922_v25  ;;  %v1387_v21 = vadd.f32 %v1386_v38, %v922_v25 }
 0x17d   : > { %v1134_v13 = vmax.f32 %v1132_v63, %v1133_v39  ;;  %v1350_v0 = vadd.f32 %v1349_v48, %v1348_v54  ;;  %v1159_v32 = vrot.slane %v1158_v15, 4  ;;  %v1375_v40 = vrot.slane %v1374_v49, 4 }
 0x17e   : > { %v1146_v24 = vrot.slane %v1145_v30, 4  ;;  %v1362_v22 = vrot.slane %v1361_v14, 4  ;;  %v1172_v37 = vrot.slane %v1171_v60, 4  ;;  %v1388_v58 = vrot.slane %v1387_v21, 4 }
 0x17f   : > { %v1135_v17 = vrot.slane %v1134_v13, 2  ;;  %v1351_v11 = vrot.slane %v1350_v0, 2  ;;  %v1160_v31 = vmax.f32 %v1158_v15, %v1159_v32  ;;  %v1376_v52 = vadd.f32 %v1375_v40, %v1374_v49 }
 0x180   : > { %v1147_v62 = vmax.f32 %v1145_v30, %v1146_v24  ;;  %v1363_v61 = vadd.f32 %v1362_v22, %v1361_v14  ;;  %v1173_v18 = vmax.f32 %v1171_v60, %v1172_v37  ;;  %v1389_v1 = vadd.f32 %v1388_v58, %v1387_v21 }
 0x181   : > { %v1136_v59 = vmax.f32 %v1134_v13, %v1135_v17  ;;  %v1352_v16 = vadd.f32 %v1351_v11, %v1350_v0  ;;  %v1161_v10 = vrot.slane %v1160_v31, 2  ;;  %v1377_v41 = vrot.slane %v1376_v52, 2 }
 0x182   : > { %v1148_v20 = vrot.slane %v1147_v62, 2  ;;  %v1364_v2 = vrot.slane %v1363_v61, 2  ;;  %v1174_v4 = vrot.slane %v1173_v18, 2  ;;  %v1390_v55 = vrot.slane %v1389_v1, 2 }
 0x183   : > { %v1137_v43 = vrot.slane %v1136_v59, 1  ;;  %v1353_v46 = vrot.slane %v1352_v16, 1  ;;  %v1162_v53 = vmax.f32 %v1160_v31, %v1161_v10  ;;  %v1378_v6 = vadd.f32 %v1377_v41, %v1376_v52 }
 0x184   : > { %v1149_v57 = vmax.f32 %v1147_v62, %v1148_v20  ;;  %v1365_v45 = vadd.f32 %v1364_v2, %v1363_v61  ;;  %v1175_v9 = vmax.f32 %v1173_v18, %v1174_v4  ;;  %v1391_v56 = vadd.f32 %v1390_v55, %v1389_v1 }
 0x185   : > { %v1138_v51 = vmax.f32 %v1136_v59, %v1137_v43  ;;  %v1354_v29 = vadd.f32 %v1353_v46, %v1352_v16  ;;  %v1163_v3 = vrot.slane %v1162_v53, 1  ;;  %v1379_v50 = vrot.slane %v1378_v6, 1 }
 0x186   : > { %v1150_v12 = vrot.slane %v1149_v57, 1  ;;  %v1366_v35 = vrot.slane %v1365_v45, 1  ;;  %v1176_v38 = vrot.slane %v1175_v9, 1  ;;  %v1392_v63 = vrot.slane %v1391_v56, 1 }
 0x187   : > { %v1164_v54 = vmax.f32 %v1162_v53, %v1163_v3  ;;  %v1380_v23 = vadd.f32 %v1379_v50, %v1378_v6  ;;  %v1212_v13 = vrot.slane %v1190_v47, %v2191_v8  ;;  %v1428_v0 = vrot.slane %v1406_v5, %v2191_v8 }
 0x188   : > { %v1151_v34 = vmax.f32 %v1149_v57, %v1150_v12  ;;  %v1367_v25 = vadd.f32 %v1366_v35, %v1365_v45  ;;  %v1177_v39 = vmax.f32 %v1175_v9, %v1176_v38  ;;  %v1393_v48 = vadd.f32 %v1392_v63, %v1391_v56 }
 0x189   : > { %v2549_v47 = vcombine.low %v2224_v7, %v2325_v44  ;;  %v2550_v17 = vcombine.low %v2312_v42, %v2328_v33 }
 0x18a   : > { %v1191_v15 = vcombine.low %v1138_v51, %v1151_v34  ;;  %v1407_v49 = vcombine.low %v1354_v29, %v1367_v25  ;;  %v1237_v30 = vcombine.low %v1164_v54, %v1177_v39  ;;  %v1453_v14 = vcombine.low %v1380_v23, %v1393_v48 }
 0x18b   : > { %v1228_v5 = vrot.slane %v2549_v47, %v2191_v8  ;;  %v1444_v11 = vrot.slane %v2550_v17, %v2191_v8 }
 0x18c   : > { %v1219_v60 = vrot.slane %v1191_v15, %v2191_v8  ;;  %v1435_v21 = vrot.slane %v1407_v49, %v2191_v8  ;;  %v1244_v32 = vrot.slane %v1237_v30, %v2191_v8  ;;  %v1460_v40 = vrot.slane %v1453_v14, %v2191_v8 }
 0x18e   : > { %v1221_v24 = vcombine.low %v1212_v13, %v1219_v60  ;;  %v1437_v22 = vcombine.low %v1428_v0, %v1435_v21  ;;  %v1251_v26 = vrot.slane %v1244_v32, %v2191_v8  ;;  %v1467_v19 = vrot.slane %v1460_v40, %v2191_v8 }
 0x190   : > { %v1235_v37 = vrot.slane %v1221_v24, %v2191_v8  ;;  %v1451_v58 = vrot.slane %v1437_v22, %v2191_v8  ;;  %v1255_v31 = vmax.f32 %v1047_v36, %v1251_v26  ;;  %v1471_v52 = vadd.f32 %v1467_v19, %v1263_v28 }
 0x192   : > { %v1452_v62 = vcombine.low %v1444_v11, %v1451_v58  ;;  %v1236_v61 = vcombine.low %v1228_v5, %v1235_v37  ;;  %1261 = vst.msk [vmem:[%s2154_s11 + $0x8] sm:$0x3] %vm2150_vm1, %v1255_v31  ;;  %1473 = vst.msk [vmem:[%s2159_s12 + $0x8] sm:$0x3] %vm2150_vm1, %v1471_v52 }
 0x194   : > { %v1254_v7 = vmax.f32 %v1236_v61, 0.0  ;;  %v1479_v8 = vmul.f32 0.015625, %v1452_v62 }
 0x196   : > { %1256 = vst [vmem:[%s2154_s11] sm:$0xff] %v1254_v7 }
 0x197   : > { %1850 = shalt.err (!%p1847_p6)
}
 0x198   : > { %s1851_s11 = scalar_lea.hbm %s2445_s8, 160  ;;  %s1855_s22 = scalar_lea.hbm %s2534_s3, 320 }
 0x199   : > { %p1852_p7 = scmp.ne.s32.totalorder %s2445_s8, %s1851_s11  ;;  %p1856_p0 = scmp.lt.u32.totalorder %s2445_s8, %s2534_s3 }
 0x19a   : > { %p1857_p2 = scmp.lt.u32.totalorder %s1855_s22, %s1851_s11  ;;  %p1859_p8 = scmp.lt.u32.totalorder %s1851_s11, %s2445_s8 }
 0x19b   : > { %p1853_p9 = pnand %p1852_p7, %p2551_p10 }
 0x19c   : > { %p1858_p4 = por %p1857_p2, %p1856_p0 }
 0x19d   : > { %p1854_p12 = pneg %p1853_p9 }
 0x19e   : > { %p1860_p11 = por %p1859_p8, %p1858_p4 }
 0x1a0   : > { %p1861_p13 = pnand %p1860_p11, %p1854_p12 }
 0x1a2   : > { %1864 = shalt.err (!%p1861_p13)
}
 0x1a3   : > { %1703 = dma.vmem_to_hbm [thread:$0]  (%p2551_p10), %s2447_s26, 160, %s2445_s8, %s1484_s29   ;;  %1481 = vst [vmem:[%s2159_s12] sm:$0xff] %v1479_v8  ;;  %v1478_v42 = vld [vmem:[%s2159_s12 + $0x8] sm:$0x3] }
 0x1a4   : > { %s1517_s6 = sshll.u32 %s2159_s12, 4  ;;  %v1480_v44 = vmul.f32 0.015625, %v1478_v42  ;;  %s2480_s13 = scalar_lea.hbm %s2535_s4, %s1697_s24  ;;  %s2482_s6 = int_to_ptr.vmem [resolvable:$true] %s1517_s6 }
 0x1a5   : > { %s1489_s11 = scalar_lea.sflag [#allocation7], %s2145_s30  ;;  %s1865_s26 = scalar_lea.vmem %s2482_s6, 160 }
 0x1a6   : > { %1482 = vst.msk [vmem:[%s2159_s12 + $0x8] sm:$0x3] %vm2150_vm1, %v1480_v44  ;;  %p1866_p1 = scmp.ne.s32.totalorder %s2482_s6, %s1865_s26  ;;  %s1960_s18 = smov [#allocation6]  }
 0x1a7   : > { %s1869_s8 = sshll.u32 %s1960_s18, 4  ;;  %s1870_s8 = int_to_ptr.vmem [resolvable:$false] %s1869_s8 }
 0x1a8   : > { %p1867_p3 = pnand %p1866_p1, %p2551_p10  ;;  %s1871_s29 = scalar_lea.vmem %s1870_s8, 320 }
 0x1a9   : > { %p1872_p6 = scmp.lt.s32.totalorder %s2482_s6, %s1870_s8  ;;  %p1873_p7 = scmp.lt.s32.totalorder %s1871_s29, %s1865_s26 }
 0x1aa   : > { %p1868_p5 = pneg %p1867_p3 }
 0x1ab   : > { %p1874_p9 = por %p1873_p7, %p1872_p6 }
 0x1ad   : > { %p1875_p12 = pnand %p1874_p9, %p1868_p5 }
 0x1af   : > { %1878 = shalt.err (!%p1875_p12)
}
 0x1b0   : > { %s1879_s30 = scalar_lea.hbm %s2480_s13, 160  ;;  %s1883_s14 = scalar_lea.hbm %s2535_s4, 320 }
 0x1b1   : > { %p1880_p0 = scmp.ne.s32.totalorder %s2480_s13, %s1879_s30  ;;  %p1884_p8 = scmp.lt.u32.totalorder %s2480_s13, %s2535_s4 }
 0x1b2   : > { %p1885_p11 = scmp.lt.u32.totalorder %s1883_s14, %s1879_s30  ;;  %p1887_p1 = scmp.lt.u32.totalorder %s1879_s30, %s2480_s13 }
 0x1b3   : > { %p1881_p2 = pnand %p1880_p0, %p2551_p10 }
 0x1b4   : > { %p1886_p13 = por %p1885_p11, %p1884_p8 }
 0x1b5   : > { %p1882_p4 = pneg %p1881_p2 }
 0x1b6   : > { %p1888_p3 = por %p1887_p1, %p1886_p13 }
 0x1b8   : > { %p1889_p5 = pnand %p1888_p3, %p1882_p4 }
 0x1ba   : > { %1892 = shalt.err (!%p1889_p5)
}
 0x1bb   : > { %1704 = dma.vmem_to_hbm [thread:$0]  (%p2551_p10), %s2482_s6, 160, %s2480_s13, %s1489_s11  }
 0x1bc PF: > { %p1720_p6 = scmp.ge.s32.totalorder %s1951_s20, 2  ;;  %s1529_s5 = sand.u32 1, %s1931_s15  }
 0x1bd   : > { %p2552_p7 = scmp.ne.s32.totalorder %s2541_s27, 0  ;;  %s1530_s7 = scalar_lea.sflag [#allocation4], %s1529_s5 }
 0x1bf   : > { %p1712_p9 = pnand %p1720_p6, %p2552_p7 }
 0x1c1   : > { %1922 = dma.done.wait (!%p1712_p9), %s1530_s7, 160  }
 0x1c2   : > { %1924 = vsyncadd (!%p1712_p9), %s1530_s7, 4294967136  ;;  %s1539_s9 = scalar_lea.sflag [#allocation7], %s1529_s5 }
 0x1c3   : > { %1926 = dma.done.wait (!%p1712_p9), %s1539_s9, 160  }
 0x1c4   : > { %1928 = vsyncadd (!%p1712_p9), %s1539_s9, 4294967136  ;;  %s22_s20 = sadd.s32 1, %s1951_s20   ;;  %s2553_s15 = smov %s1935_s16 }
 0x1c5   : > { %p19_p12 = scmp.ge.s32.totalorder %s22_s20, 4   ;;  %s2554_s16 = smov %s1939_s17 }
 0x1c6   : > { %s2555_s17 = smov %s2039_s28  ;;  %s2556_s18 = smov %s1947_s19 }
 0x1c7   : > { %s2557_s19 = smov %s2559_s23  ;;  %21 = sbr.rel (!%p19_p12) target bundleno = 7 (0x7), region = 97 }
 0x1ce   :  { %1544 = vsyncpa [#allocation3], 1 }
 0x1cf   :  { %1546 = vsyncpa [#allocation3 + $0x1], 1 }
 0x1d0   :  { %1547 = vsyncpa [#allocation4], 1 }
 0x1d1   :  { %1549 = vsyncpa [#allocation4 + $0x1], 1 }
 0x1d2   :  { %1550 = vsyncpa [#allocation7], 1 }
 0x1d3   :  { %1552 = vsyncpa [#allocation7 + $0x1], 1 }

</bundles_post_ra>
